<compile_context>
chip_gen: v7x
topology: tpu7x:2x2x1
jax: 0.10.0
libtpu: 0.0.40
codegen_flags: <defaults>
</compile_context>

<pallas_src>
import jax
import jax.numpy as jnp
from jax.experimental import pallas as pl
from jax.experimental.pallas import tpu as pltpu

_LANE = 128
_SUBLANE = 8


def _round_up(x, m):
    return ((x + m - 1) // m) * m


def _linear_kernel(x_ref, w_ref, b_ref, o_ref, acc_ref):
    """One (tB, tN) tile of  a = x @ W + b, accumulated over K blocks (axis 2)."""
    k = pl.program_id(2)

    @pl.when(k == 0)
    def _init():
        acc_ref[...] = jnp.zeros_like(acc_ref)

    acc_ref[...] += jnp.dot(x_ref[...], w_ref[...],
                            preferred_element_type=jnp.float32)

    @pl.when(k == pl.num_programs(2) - 1)
    def _finalize():
        o_ref[...] = (acc_ref[...]
                      + b_ref[...].astype(jnp.float32)).astype(o_ref.dtype)


def _vmem_bytes(tB, tK, tN, resident_w, dtype_bytes):
    x_b = 2 * tB * tK * dtype_bytes                      # double-buffered x tile
    w_b = (1 if resident_w else 2) * tK * tN * dtype_bytes
    b_b = (1 if resident_w else 2) * tN * dtype_bytes
    o_b = 2 * tB * tN * dtype_bytes                      # double-buffered out tile
    acc_b = tB * tN * 4                                  # f32 accumulator scratch
    return x_b + w_b + b_b + o_b + acc_b


def _pallas_linear(x, wA, bA, nclasses, *, block_b=512):
    """a = x @ wA.T + bA via pallas_call.  wA is PyTorch layout (nclasses, dim)."""
    B, dim = x.shape
    dtype_bytes = jnp.dtype(x.dtype).itemsize

    # ---- lane-dense output: pad N up to a multiple of the 128-lane vreg width ----
    Np = _round_up(nclasses, _LANE)

    # N tile (multiples of 256 preferred for the 2x256 MXUs of v6e/v7x).
    if Np <= 512:
        tN = Np
    elif Np % 256 == 0:
        tN = 256
    else:
        tN = 128
    grid_n = Np // tN

    # K tile: keep the full contraction resident unless dim is large, then stream.
    if dim <= 2048:
        tK, dim_p = dim, dim
    else:
        tK = 512
        dim_p = _round_up(dim, tK)
    grid_k = dim_p // tK

    resident_w = (grid_n == 1 and grid_k == 1)

    # ---- generation-aware VMEM budget ----
    try:
        vmem_cap = int(pltpu.get_tpu_info().vmem_capacity_bytes)
    except Exception:
        vmem_cap = 64 * 1024 * 1024          # conservative (v7x per-TC) fallback
    vmem_limit = int(min(vmem_cap, 128 * 1024 * 1024) // 2)
    budget = int(vmem_limit * 0.8)

    # ---- batch tile: sublane multiple, split >=2 ways when possible (v7x has
    #      2 TensorCores sharing the "parallel" batch axis), shrunk to fit VMEM ----
    tB = min(block_b, _round_up(B, _SUBLANE))
    if B >= 2 * _SUBLANE:
        tB = min(tB, _round_up(pl.cdiv(B, 2), _SUBLANE))
    tB = max(_SUBLANE, _round_up(tB, _SUBLANE))
    while tB > _SUBLANE and _vmem_bytes(tB, tK, tN, resident_w, dtype_bytes) > budget:
        tB = max(_SUBLANE, _round_up(tB // 2, _SUBLANE))
    grid_b = pl.cdiv(B, tB)

    # ---- one-time weight plumbing (weight-only traffic; resident across grid) ----
    wT = jnp.transpose(wA)                                   # (dim, nclasses): (K, N) RHS
    wT = jnp.pad(wT, ((0, dim_p - dim), (0, Np - nclasses)))
    bp = jnp.pad(bA, (0, Np - nclasses)).reshape(1, Np)
    xp = x if dim_p == dim else jnp.pad(x, ((0, 0), (0, dim_p - dim)))

    def _call(single_buffer_weight):
        if single_buffer_weight:
            # Constant index_map -> fetched once; single-buffer halves residency.
            w_spec = pl.BlockSpec((tK, tN), lambda i, j, k: (k, j),
                                  pipeline_mode=pl.Buffered(1))
            b_spec = pl.BlockSpec((1, tN), lambda i, j, k: (0, j),
                                  pipeline_mode=pl.Buffered(1))
        else:
            w_spec = pl.BlockSpec((tK, tN), lambda i, j, k: (k, j))
            b_spec = pl.BlockSpec((1, tN), lambda i, j, k: (0, j))

        return pl.pallas_call(
            _linear_kernel,
            out_shape=jax.ShapeDtypeStruct((B, Np), x.dtype),
            grid=(grid_b, grid_n, grid_k),
            in_specs=[
                pl.BlockSpec((tB, tK), lambda i, j, k: (i, k)),   # x: batch/K tiled
                w_spec,                                            # W^T: (K, N) tiles
                b_spec,                                            # bias: (1, tN)
            ],
            out_specs=pl.BlockSpec((tB, tN), lambda i, j, k: (i, j)),
            scratch_shapes=[pltpu.VMEM((tB, tN), jnp.float32)],
            compiler_params=pltpu.CompilerParams(
                dimension_semantics=("parallel", "parallel", "arbitrary"),
                vmem_limit_bytes=vmem_limit,
            ),
        )(xp, wT, bp)

    if resident_w:
        try:
            a_p = _call(True)
        except Exception:
            # pl.Buffered(1) not supported by this jax version: fall back to the
            # default double-buffered (still correct) spec.
            a_p = _call(False)
    else:
        a_p = _call(False)

    return a_p if Np == nclasses else a_p[:, :nclasses]


def async_tf_base_forward(x, wA, bA, wAAa, wAAb, nclasses, nhidden, *,
                          block_b=512, force_pallas=None, materialize_aa=True):
    """x: (B, dim).  wA: (nclasses, dim), bA: (nclasses,),
    wAAa: (nclasses*nhidden, 1), wAAb: (nhidden*nclasses, 1).
    Returns (a: (B, nclasses), aa: (B, nclasses, nclasses))."""
    B, dim = x.shape
    Np = _round_up(nclasses, _LANE)

    use_pallas = force_pallas
    if use_pallas is None:
        # Tiny problems: a single grid step of pallas_call fixed overhead
        # (~0.35 us/step + launch) beats nothing; let XLA's fused GEMM handle it.
        use_pallas = (B >= 64) and (B * dim * Np >= (1 << 21))

    if use_pallas:
        a = _pallas_linear(x, wA, bA, nclasses, block_b=block_b)
    else:
        a = (jnp.dot(x, wA.T, preferred_element_type=jnp.float32) + bA).astype(x.dtype)

    # Batch-independent branch: const == ones, so mAAa(const)/mAAb(const) just
    # select the single weight column; the (nc, naa) @ (naa, nc) product is the
    # same for every batch row -> compute once.
    Wa = wAAa[:, 0].reshape(nclasses, nhidden)     # (nc, naa)
    Wb = wAAb[:, 0].reshape(nhidden, nclasses)     # (naa, nc)
    m = jnp.dot(Wa, Wb, preferred_element_type=jnp.float32).astype(x.dtype)
    if materialize_aa:
        # Only to honor the original module's (B, nc, nc) output contract;
        # consumers that can use the shared (nc, nc) should pass materialize_aa=False.
        aa = jnp.broadcast_to(m[None, :, :], (B, nclasses, nclasses))
    else:
        aa = m
    return a, aa


def _reference(x, wA, bA, wAAa, wAAb, nclasses, nhidden):
    """Pure-JAX mirror of the PyTorch forward."""
    B = x.shape[0]
    a = x @ wA.T + bA
    const = jnp.ones((B, 1), dtype=x.dtype)
    aaa = (const @ wAAa.T).reshape(B, nclasses, nhidden)
    aab = (const @ wAAb.T).reshape(B, nhidden, nclasses)
    aa = jnp.einsum("bij,bjk->bik", aaa, aab)
    return a, aa


if __name__ == "__main__":
    key = jax.random.PRNGKey(0)

    def make_case(case_key, B, dim, nclasses, nhidden):
        k1, k2, k3, k4, k5 = jax.random.split(case_key, 5)
        x = jax.random.normal(k1, (B, dim), dtype=jnp.float32)
        wA = jax.random.normal(k2, (nclasses, dim), dtype=jnp.float32) * 0.1           # mA.weight
        bA = jax.random.normal(k3, (nclasses,), dtype=jnp.float32) * 0.1               # mA.bias
        wAAa = jax.random.normal(k4, (nclasses * nhidden, 1), dtype=jnp.float32) * 0.1  # mAAa.weight
        wAAb = jax.random.normal(k5, (nhidden * nclasses, 1), dtype=jnp.float32) * 0.1  # mAAb.weight
        return x, wA, bA, wAAa, wAAb

    cases = [
        #  B,  dim, nclasses, nhidden
        (8,     32,       16,      32),   # toy module size -> XLA fallback path
        (300,  256,       20,      16),   # resident-weight Pallas path, ragged B, N padded 20->128
        (200, 2500,      600,       8),   # tiled Pallas path: K streamed (grid_k=5), N tiled (grid_n=5)
    ]
    keys = jax.random.split(key, len(cases))
    for case_key, (B, dim, nclasses, nhidden) in zip(keys, cases):
        x, wA, bA, wAAa, wAAb = make_case(case_key, B, dim, nclasses, nhidden)

        a, aa = async_tf_base_forward(x, wA, bA, wAAa, wAAb, nclasses, nhidden)
        jax.block_until_ready((a, aa))

        a_ref, aa_ref = _reference(x, wA, bA, wAAa, wAAb, nclasses, nhidden)
        assert a.shape == (B, nclasses) and aa.shape == (B, nclasses, nclasses)
        assert jnp.allclose(a, a_ref, atol=2e-4, rtol=2e-4), ("a mismatch", B, dim, nclasses)
        assert jnp.allclose(aa, aa_ref, atol=2e-4, rtol=2e-4), ("aa mismatch", B, dim, nclasses)

    print("KERNEL_OK")
</pallas_src>

<mosaic_0001>
module attributes {stable_mosaic.version = 11 : i64} {
  func.func @_linear_kernel(%arg0: i32, %arg1: i32, %arg2: i32, %arg3: memref<152x256xf32, #tpu.memory_space<vmem>>, %arg4: memref<256x128xf32, #tpu.memory_space<vmem>>, %arg5: memref<1x128xf32, #tpu.memory_space<vmem>>, %arg6: memref<152x128xf32, #tpu.memory_space<vmem>>, %arg7: memref<152x128xf32, #tpu.memory_space<vmem>>) attributes {dimension_semantics = [#tpu.dimension_semantics<parallel>, #tpu.dimension_semantics<parallel>, #tpu.dimension_semantics<arbitrary>], iteration_bounds = array<i64: 2, 1, 1>, scalar_prefetch = 0 : i64, scratch_operands = 1 : i64, tpu.core_type = #tpu.core_type<tc>, window_params = [{transform_indices = @transform_0, window_bounds = array<i64: 152, 256>}, {pipeline_mode = #tpu.pipeline_mode<synchronous>, transform_indices = @transform_1, window_bounds = array<i64: 256, 128>}, {pipeline_mode = #tpu.pipeline_mode<synchronous>, transform_indices = @transform_2, window_bounds = array<i64: 1, 128>}, {transform_indices = @transform_3, window_bounds = array<i64: 152, 128>}]} {
    %c0_i32 = arith.constant 0 : i32
    %0 = arith.cmpi eq, %arg2, %c0_i32 : i32
    %1 = arith.extui %0 : i1 to i32
    %c0_i32_0 = arith.constant 0 : i32
    %2 = arith.cmpi ne, %1, %c0_i32_0 : i32
    scf.if %2 {
      %cst_10 = arith.constant 0.000000e+00 : f32
      %12 = vector.broadcast %cst_10 : f32 to vector<152x128xf32>
      %c0_11 = arith.constant 0 : index
      %c0_12 = arith.constant 0 : index
      %13 = vector.load %arg7[%c0_11, %c0_12] : memref<152x128xf32, #tpu.memory_space<vmem>>, vector<152x128xf32>
      tpu.vector_store %arg7[%c0_11, %c0_12], %12 {strides = array<i32>} : memref<152x128xf32, #tpu.memory_space<vmem>>, vector<152x128xf32>,
    } else {
    }
    %c0 = arith.constant 0 : index
    %c0_1 = arith.constant 0 : index
    %3 = vector.load %arg7[%c0, %c0_1] : memref<152x128xf32, #tpu.memory_space<vmem>>, vector<152x128xf32>
    %c0_2 = arith.constant 0 : index
    %c0_3 = arith.constant 0 : index
    %4 = vector.load %arg3[%c0_2, %c0_3] : memref<152x256xf32, #tpu.memory_space<vmem>>, vector<152x256xf32>
    %c0_4 = arith.constant 0 : index
    %c0_5 = arith.constant 0 : index
    %5 = vector.load %arg4[%c0_4, %c0_5] : memref<256x128xf32, #tpu.memory_space<vmem>>, vector<256x128xf32>
    %cst = arith.constant dense<0.000000e+00> : vector<152x128xf32>
    %6 = tpu.matmul %4, %5, %cst {dimension_numbers = #tpu.dot_dimension_numbers<[1], [0], [0], [1], [0, 0, 1, 1], [], []>} : vector<152x256xf32>, vector<256x128xf32>, vector<152x128xf32> -> vector<152x128xf32>
    %7 = arith.addf %3, %6 : vector<152x128xf32>
    %c0_6 = arith.constant 0 : index
    %c0_7 = arith.constant 0 : index
    %8 = vector.load %arg7[%c0_6, %c0_7] : memref<152x128xf32, #tpu.memory_space<vmem>>, vector<152x128xf32>
    tpu.vector_store %arg7[%c0_6, %c0_7], %7 {strides = array<i32>} : memref<152x128xf32, #tpu.memory_space<vmem>>, vector<152x128xf32>,
    %c0_i32_8 = arith.constant 0 : i32
    %9 = arith.cmpi eq, %arg2, %c0_i32_8 : i32
    %10 = arith.extui %9 : i1 to i32
    %c0_i32_9 = arith.constant 0 : i32
    %11 = arith.cmpi ne, %10, %c0_i32_9 : i32
    scf.if %11 {
      %c0_10 = arith.constant 0 : index
      %c0_11 = arith.constant 0 : index
      %12 = vector.load %arg7[%c0_10, %c0_11] : memref<152x128xf32, #tpu.memory_space<vmem>>, vector<152x128xf32>
      %c0_12 = arith.constant 0 : index
      %c0_13 = arith.constant 0 : index
      %13 = vector.load %arg5[%c0_12, %c0_13] : memref<1x128xf32, #tpu.memory_space<vmem>>, vector<1x128xf32>
      %14 = vector.broadcast %13 : vector<1x128xf32> to vector<152x128xf32>
      %15 = arith.addf %12, %14 : vector<152x128xf32>
      %c0_14 = arith.constant 0 : index
      %c0_15 = arith.constant 0 : index
      %16 = vector.load %arg6[%c0_14, %c0_15] : memref<152x128xf32, #tpu.memory_space<vmem>>, vector<152x128xf32>
      tpu.vector_store %arg6[%c0_14, %c0_15], %15 {strides = array<i32>} : memref<152x128xf32, #tpu.memory_space<vmem>>, vector<152x128xf32>,
    } else {
    }
    return
  }
  func.func @transform_0(%arg0: i32, %arg1: i32, %arg2: i32) -> (i32, i32) {
    %c0_i32 = arith.constant 0 : i32
    return %arg0, %arg2 : i32, i32
  }
  func.func @transform_1(%arg0: i32, %arg1: i32, %arg2: i32) -> (i32, i32) {
    %c0_i32 = arith.constant 0 : i32
    return %arg2, %arg1 : i32, i32
  }
  func.func @transform_2(%arg0: i32, %arg1: i32, %arg2: i32) -> (i32, i32) {
    %c0_i32 = arith.constant 0 : i32
    %c0_i32_0 = arith.constant 0 : i32
    return %c0_i32, %arg1 : i32, i32
  }
  func.func @transform_3(%arg0: i32, %arg1: i32, %arg2: i32) -> (i32, i32) {
    %c0_i32 = arith.constant 0 : i32
    return %arg0, %arg1 : i32, i32
  }
}

module attributes {stable_mosaic.version = 11 : i64} {
  func.func @_linear_kernel(%arg0: i32, %arg1: i32, %arg2: i32, %arg3: memref<152x256xf32, #tpu.memory_space<vmem>>, %arg4: memref<256x128xf32, #tpu.memory_space<vmem>>, %arg5: memref<1x128xf32, #tpu.memory_space<vmem>>, %arg6: memref<152x128xf32, #tpu.memory_space<vmem>>, %arg7: memref<152x128xf32, #tpu.memory_space<vmem>>) attributes {dimension_semantics = [#tpu.dimension_semantics<parallel>, #tpu.dimension_semantics<parallel>, #tpu.dimension_semantics<arbitrary>], iteration_bounds = array<i64: 2, 1, 1>, scalar_prefetch = 0 : i64, scratch_operands = 1 : i64, tpu.core_type = #tpu.core_type<tc>, window_params = [{transform_indices = @transform_0, window_bounds = array<i64: 152, 256>}, {transform_indices = @transform_1, window_bounds = array<i64: 256, 128>}, {transform_indices = @transform_2, window_bounds = array<i64: 1, 128>}, {transform_indices = @transform_3, window_bounds = array<i64: 152, 128>}]} {
    %c0_i32 = arith.constant 0 : i32
    %0 = arith.cmpi eq, %arg2, %c0_i32 : i32
    %1 = arith.extui %0 : i1 to i32
    %c0_i32_0 = arith.constant 0 : i32
    %2 = arith.cmpi ne, %1, %c0_i32_0 : i32
    scf.if %2 {
      %cst_10 = arith.constant 0.000000e+00 : f32
      %12 = vector.broadcast %cst_10 : f32 to vector<152x128xf32>
      %c0_11 = arith.constant 0 : index
      %c0_12 = arith.constant 0 : index
      %13 = vector.load %arg7[%c0_11, %c0_12] : memref<152x128xf32, #tpu.memory_space<vmem>>, vector<152x128xf32>
      tpu.vector_store %arg7[%c0_11, %c0_12], %12 {strides = array<i32>} : memref<152x128xf32, #tpu.memory_space<vmem>>, vector<152x128xf32>,
    } else {
    }
    %c0 = arith.constant 0 : index
    %c0_1 = arith.constant 0 : index
    %3 = vector.load %arg7[%c0, %c0_1] : memref<152x128xf32, #tpu.memory_space<vmem>>, vector<152x128xf32>
    %c0_2 = arith.constant 0 : index
    %c0_3 = arith.constant 0 : index
    %4 = vector.load %arg3[%c0_2, %c0_3] : memref<152x256xf32, #tpu.memory_space<vmem>>, vector<152x256xf32>
    %c0_4 = arith.constant 0 : index
    %c0_5 = arith.constant 0 : index
    %5 = vector.load %arg4[%c0_4, %c0_5] : memref<256x128xf32, #tpu.memory_space<vmem>>, vector<256x128xf32>
    %cst = arith.constant dense<0.000000e+00> : vector<152x128xf32>
    %6 = tpu.matmul %4, %5, %cst {dimension_numbers = #tpu.dot_dimension_numbers<[1], [0], [0], [1], [0, 0, 1, 1], [], []>} : vector<152x256xf32>, vector<256x128xf32>, vector<152x128xf32> -> vector<152x128xf32>
    %7 = arith.addf %3, %6 : vector<152x128xf32>
    %c0_6 = arith.constant 0 : index
    %c0_7 = arith.constant 0 : index
    %8 = vector.load %arg7[%c0_6, %c0_7] : memref<152x128xf32, #tpu.memory_space<vmem>>, vector<152x128xf32>
    tpu.vector_store %arg7[%c0_6, %c0_7], %7 {strides = array<i32>} : memref<152x128xf32, #tpu.memory_space<vmem>>, vector<152x128xf32>,
    %c0_i32_8 = arith.constant 0 : i32
    %9 = arith.cmpi eq, %arg2, %c0_i32_8 : i32
    %10 = arith.extui %9 : i1 to i32
    %c0_i32_9 = arith.constant 0 : i32
    %11 = arith.cmpi ne, %10, %c0_i32_9 : i32
    scf.if %11 {
      %c0_10 = arith.constant 0 : index
      %c0_11 = arith.constant 0 : index
      %12 = vector.load %arg7[%c0_10, %c0_11] : memref<152x128xf32, #tpu.memory_space<vmem>>, vector<152x128xf32>
      %c0_12 = arith.constant 0 : index
      %c0_13 = arith.constant 0 : index
      %13 = vector.load %arg5[%c0_12, %c0_13] : memref<1x128xf32, #tpu.memory_space<vmem>>, vector<1x128xf32>
      %14 = vector.broadcast %13 : vector<1x128xf32> to vector<152x128xf32>
      %15 = arith.addf %12, %14 : vector<152x128xf32>
      %c0_14 = arith.constant 0 : index
      %c0_15 = arith.constant 0 : index
      %16 = vector.load %arg6[%c0_14, %c0_15] : memref<152x128xf32, #tpu.memory_space<vmem>>, vector<152x128xf32>
      tpu.vector_store %arg6[%c0_14, %c0_15], %15 {strides = array<i32>} : memref<152x128xf32, #tpu.memory_space<vmem>>, vector<152x128xf32>,
    } else {
    }
    return
  }
  func.func @transform_0(%arg0: i32, %arg1: i32, %arg2: i32) -> (i32, i32) {
    %c0_i32 = arith.constant 0 : i32
    return %arg0, %arg2 : i32, i32
  }
  func.func @transform_1(%arg0: i32, %arg1: i32, %arg2: i32) -> (i32, i32) {
    %c0_i32 = arith.constant 0 : i32
    return %arg2, %arg1 : i32, i32
  }
  func.func @transform_2(%arg0: i32, %arg1: i32, %arg2: i32) -> (i32, i32) {
    %c0_i32 = arith.constant 0 : i32
    %c0_i32_0 = arith.constant 0 : i32
    return %c0_i32, %arg1 : i32, i32
  }
  func.func @transform_3(%arg0: i32, %arg1: i32, %arg2: i32) -> (i32, i32) {
    %c0_i32 = arith.constant 0 : i32
    return %arg0, %arg1 : i32, i32
  }
}

</mosaic_0001>

<bundles_post_ra>
// kernel: tpu_custom_call.1
= control target key start
LH: loop header
LB: loop body
LE: loop exit
PB: predicated region body
PF: predicated region fallthrough
CT: control target
= control target key end

     0   :  { %8 = vsyncpa [#allocation4], 0  ;;  %s1455_s0 = inlined_call_operand.hbm [shape: f32[300,256], index: 0, kind: input, shape index: {}]   ;;  %s1456_s1 = inlined_call_operand.hbm [shape: f32[256,128], index: 1, kind: input, shape index: {}]   ;;  %s1457_s2 = inlined_call_operand.vmem [shape: f32[1,128], index: 2, kind: input, shape index: {}]   ;;  %s1458_s3 = inlined_call_operand.hbm [shape: f32[300,128], index: 3, kind: output, shape index: {}]  }
   0x1   :  { %10 = vsyncpa [#allocation4 + $0x1], 0 }
   0x2   :  { %11 = vsyncpa [#allocation7], 0 }
   0x3   :  { %12 = vsyncpa [#allocation5], 0 }
   0x4   :  { %14 = vsyncpa [#allocation5 + $0x1], 0  ;;  %s1123_s12 = smov 0   ;;  %s1125_s13 = smov 0  }
   0x5   :  { %s1127_s14 = smov 0   ;;  %s1129_s15 = smov 0  }
   0x6   :  { %s1131_s16 = smov 0   ;;  %s1133_s17 = smov 0  }
   0x7 LB: > { %s766_s18 = sadd.s32 4294967295, %s1091_s17   ;;  %s767_s19 = sadd.s32 4294967294, %s1091_s17   ;;  %s1091_s17 = sphi %s1133_s17, %s20_s17   ;;  %s1087_s16 = sphi %s1131_s16, %s1481_s16   ;;  %s1083_s15 = sphi %s1129_s15, %s1480_s15   ;;  %s1079_s14 = sphi %s1127_s14, %s1479_s14   ;;  %s1075_s13 = sphi %s1125_s13, %s1478_s13   ;;  %s1071_s12 = sphi %s1123_s12, %s1477_s12  }
   0x8   : > { %p61_p0 = scmp.ne.s32.totalorder %s1075_s13, %s1071_s12  ;;  %p1157_p1 = scmp.eq.s32.totalorder %s766_s18, 0 }
   0x9   : > { %p1161_p2 = scmp.eq.s32.totalorder %s766_s18, 1  ;;  %p147_p3 = scmp.eq.s32.totalorder %s767_s19, 1 }
   0xa   : > { %s1463_s20 = scalar_select %p1157_p1, 1, 0 }
   0xb   : > { %s1464_s21 = scalar_select %p1161_p2, 1, 0 }
   0xc   : > { %p1167_p4 = por %p1157_p1, %p61_p0  ;;  %p768_p5 = scmp.ge.s32.totalorder %s1091_s17, 1 }
   0xd   : > { %p1172_p6 = por %p147_p3, %p61_p0  ;;  %p154_p7 = scmp.lt.s32.totalorder %s1091_s17, 3 }
   0xe   : > { %s1465_s22 = scalar_select %p1167_p4, 1, 0 }
   0xf   : > { %s1466_s23 = scalar_select %p1172_p6, 1, 0 }
  0x10   : > { %p1177_p8 = pnand %p768_p5, %p154_p7  ;;  %s1093_s25 = smov [#allocation6]  }
  0x11   : > { %s170_s26 = sshll.u32 %s1093_s25, 4  ;;  %s39_s28 = sadd.s32 1, %s1087_s16  ;;  %s171_s26 = int_to_ptr.vmem [resolvable:$true] %s170_s26 }
  0x12   : > { %s1467_s24 = scalar_select %p1177_p8, 1, 0 }
  0x13   : > { %p875_p9 = pneg %p1177_p8  ;;  %s947_s4 = scalar_lea.hbm %s1456_s1, 4096 }
  0x14   : > { %p948_p12 = scmp.ne.s32.totalorder %s1456_s1, %s947_s4  ;;  %p954_p5 = scmp.lt.u32.totalorder %s947_s4, %s1456_s1 }
  0x15   : > { %p1186_p11 = pnand %p875_p9, %p1157_p1 }
  0x17   : > { %p949_p13 = pneg %p1186_p11 }
  0x19   : > { %p950_p0 = pnand %p949_p13, %p948_p12 }
  0x1b   : > { %p951_p3 = pneg %p950_p0 }
  0x1d   : > { %p956_p7 = pnand %p954_p5, %p951_p3 }
  0x1f   : > { %959 = shalt.err (!%p956_p7)
}
  0x20   : > { %s960_s9 = scalar_lea.vmem %s171_s26, 4096  ;;  %p968_p1 = scmp.lt.s32.totalorder %s171_s26, %s171_s26 }
  0x21   : > { %p961_p9 = scmp.ne.s32.totalorder %s171_s26, %s960_s9  ;;  %p969_p4 = scmp.lt.s32.totalorder %s960_s9, %s960_s9 }
  0x23   : > { %p963_p10 = pnand %p961_p9, %p949_p13  ;;  %p970_p8 = por %p969_p4, %p968_p1 }
  0x25   : > { %p964_p6 = pneg %p963_p10 }
  0x27   : > { %p971_p2 = pnand %p970_p8, %p964_p6 }
  0x29   : > { %974 = shalt.err (!%p971_p2)
}
  0x2a   : > { %s1094_s10 = smov 128   ;;  %s1095_s11 = smov 8  }
  0x2b   : > { %878 = dma.hbm_to_vmem [thread:$0]  (!%p1186_p11), %s1456_s1, 4096, %s171_s26, [#allocation7], %s1094_s10, %s1094_s10, %s1095_s11  }
  0x2c   : > { %p41_p1 = scmp.ge.s32.totalorder %s39_s28, 2  ;;  %s48_s25 = sadd.s32 1, %s1079_s14 }
  0x2d   : > { %p55_p2 = scmp.ne.s32.totalorder %s1079_s14, %s1075_s13  ;;  %p56_p4 = scmp.eq.s32.totalorder %s1091_s17, 0 }
  0x2e   : > { %s1483_s28 = smov (%p41_p1, %s39_s28), 0  ;;  %p1469_p8 = scmp.ne.s32.totalorder %s1464_s21, 0 }
  0x2f   : > { %p57_p6 = por %p56_p4, %p55_p2  ;;  %s43_s30 = ssub.s32 %s1087_s16, %s1483_s28 }
  0x30   : > { %p1215_p10 = por %p1469_p8, %p55_p2  ;;  %p888_p12 = scmp.lt.s32.totalorder %s1091_s17, 2 }
  0x31   : > { %p46_p13 = scmp.eq.s32.totalorder %s43_s30, 0  ;;  %s190_s27 = sand.u32 1, %s1079_s14  }
  0x32   : > { %s864_s4 = smul.u32 304, %s190_s27  ;;  %p1227_p11 = pnand %p888_p12, %p57_p6 }
  0x33   : > { %s1224_s5 = scalar_select %p46_p13, %s1079_s14, %s48_s25  }
  0x34   : > { %s783_s26 = smul.u32 4864, %s1087_s16  ;;  %s194_s6 = scalar_lea.vmem [#allocation3], %s864_s4 }
  0x35   : > { %s204_s7 = sshll.u32 %s194_s6, 4  ;;  %s1238_s11 = scalar_lea.sflag [#allocation4], %s190_s27  ;;  %s1236_s7 = int_to_ptr.vmem [resolvable:$true] %s204_s7 }
  0x36   : > { %s1234_s10 = scalar_lea.hbm %s1455_s0, %s783_s26  ;;  %p977_p3 = pneg %p1227_p11 }
  0x37   : > { %s975_s18 = scalar_lea.hbm %s1234_s10, 4864  ;;  %s980_s30 = scalar_lea.hbm %s1455_s0, 9728 }
  0x38   : > { %p976_p0 = scmp.ne.s32.totalorder %s1234_s10, %s975_s18  ;;  %p981_p9 = scmp.lt.u32.totalorder %s1234_s10, %s1455_s0 }
  0x39   : > { %p982_p1 = scmp.lt.u32.totalorder %s980_s30, %s975_s18  ;;  %p984_p4 = scmp.lt.u32.totalorder %s975_s18, %s1234_s10 }
  0x3a   : > { %p978_p5 = pnand %p977_p3, %p976_p0 }
  0x3b   : > { %p983_p2 = por %p982_p1, %p981_p9 }
  0x3c   : > { %p979_p7 = pneg %p978_p5 }
  0x3d   : > { %p985_p6 = por %p984_p4, %p983_p2 }
  0x3f   : > { %p986_p8 = pnand %p985_p6, %p979_p7 }
  0x41   : > { %989 = shalt.err (!%p986_p8)
}
  0x42   : > { %s990_s27 = scalar_lea.vmem %s1236_s7, 4864  ;;  %s1096_s6 = smov [#allocation3]  }
  0x43   : > { %p991_p12 = scmp.ne.s32.totalorder %s1236_s7, %s990_s27  ;;  %s995_s9 = sshll.u32 %s1096_s6, 4  ;;  %s996_s9 = int_to_ptr.vmem [resolvable:$false] %s995_s9 }
  0x44   : > { %s997_s21 = scalar_lea.vmem %s996_s9, 9728  ;;  %p998_p5 = scmp.lt.s32.totalorder %s1236_s7, %s996_s9 }
  0x45   : > { %p993_p13 = pnand %p991_p12, %p977_p3  ;;  %p999_p9 = scmp.lt.s32.totalorder %s997_s21, %s990_s27 }
  0x47   : > { %p994_p0 = pneg %p993_p13  ;;  %p1000_p1 = por %p999_p9, %p998_p5 }
  0x49   : > { %p1001_p2 = pnand %p1000_p1, %p994_p0 }
  0x4b   : > { %1004 = shalt.err (!%p1001_p2)
}
  0x4c   : > { %s1097_s18 = smov 256   ;;  %s1098_s19 = smov 16  }
  0x4d   : > { %882 = dma.hbm_to_vmem [thread:$0]  (!%p1227_p11), %s1234_s10, 4864, %s1236_s7, %s1238_s11, %s1097_s18, %s1097_s18, %s1098_s19  }
  0x4e   : > { %p1472_p3 = scmp.ne.s32.totalorder %s1467_s24, 0 }
  0x4f   : > { %s1269_s25 = sand.u32 (!%p1472_p3), 1, %s1075_s13   ;;  %p1473_p7 = scmp.ne.s32.totalorder (!%p1472_p3), %s1465_s22, 0 }
  0x50   : > { %216 = sbr.rel (%p1472_p3) target bundleno = 422 (0x1a6), region = 32  ;;  %s219_s4 = scalar_lea.sflag (!%p1472_p3), [#allocation4], %s1269_s25 }
  0x51   : > { %s865_s30 = smul.u32 (!%p1472_p3), 304, %s1269_s25 }
  0x53   : > { %s1273_s26 = scalar_lea.vmem (!%p1472_p3), [#allocation3], %s865_s30 }
  0x57   : > { %1058 = dma.done.wait (%p1473_p7), %s219_s4, 4864  }
  0x58   : > { %1060 = vsyncadd (%p1473_p7), %s219_s4, 4294962432  ;;  %p1474_p11 = scmp.ne.s32.totalorder %s1463_s20, 0 }
  0x5a   : > { %1062 = dma.done.wait (%p1474_p11), [#allocation7], 4096  }
  0x5b   : > { %1064 = vsyncadd (%p1474_p11), [#allocation7], 4294963200  ;;  %v1099_v0 = vmov 0.0|0.0   ;;  %v339_v1 = vld [vmem:[#allocation6] sm:$0xff]  ;;  %v340_v2 = vld [vmem:[#allocation6 + $0x8] sm:$0xff]  ;;  %s866_s20 = smul.u32 152, %s1269_s25 }
  0x5c   : > { %784 = vmatprep.subr.bf16.mxu0 %v1099_v0  ;;  %832 = vmatprep.subr.bf16.mxu1 %v1099_v0  ;;  %v341_v3 = vld [vmem:[#allocation6 + $0x10] sm:$0xff]  ;;  %v785_v4 = vpack.c.bf16 %v340_v2, %v339_v1  ;;  %v342_v5 = vld [vmem:[#allocation6 + $0x18] sm:$0xff]  ;;  %v343_v7 = vld [vmem:[#allocation6 + $0x20] sm:$0xff]  ;;  %s782_s8 = smul.u32 2432, %s1083_s15  ;;  %s637_s15 = scalar_lea.sflag [#allocation5], %s1269_s25 }
  0x5d   : > { %v788_v6 = vpack.c.bf16 %v342_v5, %v341_v3  ;;  %v344_v8 = vld [vmem:[#allocation6 + $0x28] sm:$0xff]  ;;  %v345_v10 = vld [vmem:[#allocation6 + $0x30] sm:$0xff]  ;;  %v346_v11 = vld [vmem:[#allocation6 + $0x38] sm:$0xff]  ;;  %s1361_s7 = scalar_lea.vmem [#allocation8], %s866_s20  ;;  %s1100_s21 = smov [#allocation8]  }
  0x5e   : > { %786 = vmatpush1.bf16.msra.mxu0 %v785_v4  ;;  %848 = vmatpush1.bf16.msra.mxu1 %v785_v4  ;;  %v791_v9 = vpack.c.bf16 %v344_v8, %v343_v7  ;;  %v302_v12 = vld [vmem:[%s1273_s26 + $0x8] sm:$0xff]  ;;  %v794_v13 = vpack.c.bf16 %v346_v11, %v345_v10  ;;  %v347_v15 = vld [vmem:[#allocation6 + $0x40] sm:$0xff]  ;;  %v349_v18 = vld [vmem:[#allocation6 + $0x50] sm:$0xff]  ;;  %s651_s10 = sshll.u32 %s1361_s7, 4  ;;  %s1402_s6 = scalar_lea.hbm %s1458_s3, %s782_s8  ;;  %s1404_s10 = int_to_ptr.vmem [resolvable:$true] %s651_s10 }
  0x5f   : > { %787 = vmatprep.subr.bf16.mxu0 %v1099_v0  ;;  %833 = vmatprep.subr.bf16.mxu1 %v1099_v0  ;;  %v322_v14 = vld [vmem:[%s1273_s26 + $0xa8] sm:$0xff]  ;;  %v351_v21 = vld [vmem:[#allocation6 + $0x60] sm:$0xff]  ;;  %v353_v24 = vld [vmem:[#allocation6 + $0x70] sm:$0xff]  ;;  %s1005_s9 = scalar_lea.vmem %s1404_s10, 2432  ;;  %s1009_s18 = sshll.u32 %s1100_s21, 4  ;;  %s1010_s18 = int_to_ptr.vmem [resolvable:$false] %s1009_s18 }
  0x60   : > { %v348_v16 = vld [vmem:[#allocation6 + $0x48] sm:$0xff]  ;;  %435 = vmatprep.mubr.f32.mxu0 %v302_v12  ;;  %485 = vmatprep.mubr.f32.mxu1 %v322_v14  ;;  %v350_v19 = vld [vmem:[#allocation6 + $0x58] sm:$0xff]  ;;  %v355_v27 = vld [vmem:[#allocation6 + $0x80] sm:$0xff]  ;;  %p1006_p4 = scmp.ne.s32.totalorder %s1404_s10, %s1005_s9  ;;  %s1011_s19 = scalar_lea.vmem %s1010_s18, 4864 }
  0x61   : > { %v797_v17 = vpack.c.bf16 %v348_v16, %v347_v15  ;;  %v800_v20 = vpack.c.bf16 %v350_v19, %v349_v18  ;;  %v352_v22 = vld [vmem:[#allocation6 + $0x68] sm:$0xff]  ;;  %v354_v25 = vld [vmem:[#allocation6 + $0x78] sm:$0xff]  ;;  %v357_v30 = vld [vmem:[#allocation6 + $0x90] sm:$0xff]  ;;  %p1012_p12 = scmp.lt.s32.totalorder %s1404_s10, %s1010_s18  ;;  %p1013_p13 = scmp.lt.s32.totalorder %s1011_s19, %s1005_s9 }
  0x62   : > { %789 = vmatpush1.bf16.msra.mxu0 %v788_v6  ;;  %849 = vmatpush1.bf16.msra.mxu1 %v788_v6  ;;  %v803_v23 = vpack.c.bf16 %v352_v22, %v351_v21  ;;  %v806_v26 = vpack.c.bf16 %v354_v25, %v353_v24  ;;  %v356_v28 = vld [vmem:[#allocation6 + $0x88] sm:$0xff]  ;;  %v358_v31 = vld [vmem:[#allocation6 + $0x98] sm:$0xff]  ;;  %v359_v33 = vld [vmem:[#allocation6 + $0xa0] sm:$0xff]  ;;  %p1007_p6 = pnand %p1006_p4, %p1215_p10 }
  0x63   : > { %790 = vmatprep.subr.bf16.mxu0 %v1099_v0  ;;  %834 = vmatprep.subr.bf16.mxu1 %v1099_v0  ;;  %v809_v29 = vpack.c.bf16 %v356_v28, %v355_v27  ;;  %v812_v32 = vpack.c.bf16 %v358_v31, %v357_v30  ;;  %v360_v34 = vld [vmem:[#allocation6 + $0xa8] sm:$0xff]  ;;  %v361_v36 = vld [vmem:[#allocation6 + $0xb0] sm:$0xff]  ;;  %v362_v37 = vld [vmem:[#allocation6 + $0xb8] sm:$0xff]  ;;  %p1014_p0 = por %p1013_p13, %p1012_p12 }
  0x64   : > { %v815_v35 = vpack.c.bf16 %v360_v34, %v359_v33  ;;  %v818_v38 = vpack.c.bf16 %v362_v37, %v361_v36  ;;  %v363_v39 = vld [vmem:[#allocation6 + $0xc0] sm:$0xff]  ;;  %v364_v40 = vld [vmem:[#allocation6 + $0xc8] sm:$0xff]  ;;  %v365_v42 = vld [vmem:[#allocation6 + $0xd0] sm:$0xff]  ;;  %p1008_p8 = pneg %p1007_p6 }
  0x65   : > { %v821_v41 = vpack.c.bf16 %v364_v40, %v363_v39  ;;  %v366_v43 = vld [vmem:[#allocation6 + $0xd8] sm:$0xff]  ;;  %v367_v45 = vld [vmem:[#allocation6 + $0xe0] sm:$0xff]  ;;  %v368_v46 = vld [vmem:[#allocation6 + $0xe8] sm:$0xff] }
  0x66   : > { %792 = vmatpush1.bf16.msra.mxu0 %v791_v9  ;;  %850 = vmatpush1.bf16.msra.mxu1 %v791_v9  ;;  %v824_v44 = vpack.c.bf16 %v366_v43, %v365_v42  ;;  %v827_v47 = vpack.c.bf16 %v368_v46, %v367_v45  ;;  %v369_v48 = vld [vmem:[#allocation6 + $0xf0] sm:$0xff]  ;;  %v370_v49 = vld [vmem:[#allocation6 + $0xf8] sm:$0xff]  ;;  %p1015_p5 = pnand %p1014_p0, %p1008_p8 }
  0x67   : > { %793 = vmatprep.subr.bf16.mxu0 %v1099_v0  ;;  %835 = vmatprep.subr.bf16.mxu1 %v1099_v0  ;;  %v830_v50 = vpack.c.bf16 %v370_v49, %v369_v48  ;;  %v301_v51 = vld [vmem:[%s1273_s26] sm:$0xff]  ;;  %v304_v53 = vld [vmem:[%s1273_s26 + $0x18] sm:$0xff]  ;;  %v303_v55 = vld [vmem:[%s1273_s26 + $0x10] sm:$0xff] }
  0x68   : > { %v321_v52 = vld [vmem:[%s1273_s26 + $0xa0] sm:$0xff]  ;;  %v324_v54 = vld [vmem:[%s1273_s26 + $0xb8] sm:$0xff]  ;;  %v323_v56 = vld [vmem:[%s1273_s26 + $0xb0] sm:$0xff] }
  0x69   : > { %v306_v57 = vld [vmem:[%s1273_s26 + $0x28] sm:$0xff]  ;;  %v305_v59 = vld [vmem:[%s1273_s26 + $0x20] sm:$0xff]  ;;  %v308_v61 = vld [vmem:[%s1273_s26 + $0x38] sm:$0xff] }
  0x6a   : > { %795 = vmatpush1.bf16.msra.mxu0 %v794_v13  ;;  %851 = vmatpush1.bf16.msra.mxu1 %v794_v13  ;;  %v326_v58 = vld [vmem:[%s1273_s26 + $0xc8] sm:$0xff]  ;;  %v325_v60 = vld [vmem:[%s1273_s26 + $0xc0] sm:$0xff]  ;;  %v328_v62 = vld [vmem:[%s1273_s26 + $0xd8] sm:$0xff] }
  0x6b   : > { %796 = vmatprep.subr.bf16.mxu0 %v1099_v0  ;;  %836 = vmatprep.subr.bf16.mxu1 %v1099_v0  ;;  %v307_v63 = vld [vmem:[%s1273_s26 + $0x30] sm:$0xff]  ;;  %v310_v1 = vld [vmem:[%s1273_s26 + $0x48] sm:$0xff]  ;;  %v309_v3 = vld [vmem:[%s1273_s26 + $0x40] sm:$0xff] }
  0x6c   : > { %v330_v2 = vld [vmem:[%s1273_s26 + $0xe8] sm:$0xff]  ;;  %v329_v4 = vld [vmem:[%s1273_s26 + $0xe0] sm:$0xff]  ;;  %v312_v5 = vld [vmem:[%s1273_s26 + $0x58] sm:$0xff] }
  0x6d   : > { %v332_v6 = vld [vmem:[%s1273_s26 + $0xf8] sm:$0xff]  ;;  %v311_v7 = vld [vmem:[%s1273_s26 + $0x50] sm:$0xff]  ;;  %v314_v9 = vld [vmem:[%s1273_s26 + $0x68] sm:$0xff] }
  0x6e   : > { %798 = vmatpush1.bf16.msra.mxu0 %v797_v17  ;;  %852 = vmatpush1.bf16.msra.mxu1 %v797_v17  ;;  %v331_v8 = vld [vmem:[%s1273_s26 + $0xf0] sm:$0xff]  ;;  %v334_v10 = vld [vmem:[%s1273_s26 + $0x108] sm:$0xff]  ;;  %v313_v11 = vld [vmem:[%s1273_s26 + $0x60] sm:$0xff] }
  0x6f   : > { %799 = vmatprep.subr.bf16.mxu0 %v1099_v0  ;;  %837 = vmatprep.subr.bf16.mxu1 %v1099_v0  ;;  %v333_v12 = vld [vmem:[%s1273_s26 + $0x100] sm:$0xff]  ;;  %v316_v13 = vld [vmem:[%s1273_s26 + $0x78] sm:$0xff]  ;;  %v315_v15 = vld [vmem:[%s1273_s26 + $0x70] sm:$0xff] }
  0x70   : > { %v336_v14 = vld [vmem:[%s1273_s26 + $0x118] sm:$0xff]  ;;  %v335_v16 = vld [vmem:[%s1273_s26 + $0x110] sm:$0xff]  ;;  %v318_v17 = vld [vmem:[%s1273_s26 + $0x88] sm:$0xff] }
  0x71   : > { %v338_v18 = vld [vmem:[%s1273_s26 + $0x128] sm:$0xff]  ;;  %v317_v19 = vld [vmem:[%s1273_s26 + $0x80] sm:$0xff]  ;;  %v320_v21 = vld [vmem:[%s1273_s26 + $0x98] sm:$0xff] }
  0x72   : > { %801 = vmatpush1.bf16.msra.mxu0 %v800_v20  ;;  %853 = vmatpush1.bf16.msra.mxu1 %v800_v20  ;;  %v337_v20 = vld [vmem:[%s1273_s26 + $0x120] sm:$0xff]  ;;  %v319_v22 = vld [vmem:[%s1273_s26 + $0x90] sm:$0xff] }
  0x73   : > { %802 = vmatprep.subr.bf16.mxu0 %v1099_v0  ;;  %838 = vmatprep.subr.bf16.mxu1 %v1099_v0 }
  0x76   : > { %804 = vmatpush1.bf16.msra.mxu0 %v803_v23  ;;  %854 = vmatpush1.bf16.msra.mxu1 %v803_v23  ;;  %v1357_v23 = vld [vmem:[%s1457_s2] ss:$0 sm:$0xff] }
  0x77   : > { %805 = vmatprep.subr.bf16.mxu0 %v1099_v0  ;;  %839 = vmatprep.subr.bf16.mxu1 %v1099_v0 }
  0x7a   : > { %807 = vmatpush1.bf16.msra.mxu0 %v806_v26  ;;  %855 = vmatpush1.bf16.msra.mxu1 %v806_v26 }
  0x7b   : > { %808 = vmatprep.subr.bf16.mxu0 %v1099_v0  ;;  %840 = vmatprep.subr.bf16.mxu1 %v1099_v0 }
  0x7e   : > { %810 = vmatpush1.bf16.msra.mxu0 %v809_v29  ;;  %856 = vmatpush1.bf16.msra.mxu1 %v809_v29 }
  0x7f   : > { %811 = vmatprep.subr.bf16.mxu0 %v1099_v0  ;;  %841 = vmatprep.subr.bf16.mxu1 %v1099_v0 }
  0x82   : > { %813 = vmatpush1.bf16.msra.mxu0 %v812_v32  ;;  %857 = vmatpush1.bf16.msra.mxu1 %v812_v32 }
  0x83   : > { %814 = vmatprep.subr.bf16.mxu0 %v1099_v0  ;;  %842 = vmatprep.subr.bf16.mxu1 %v1099_v0 }
  0x86   : > { %816 = vmatpush1.bf16.msra.mxu0 %v815_v35  ;;  %858 = vmatpush1.bf16.msra.mxu1 %v815_v35 }
  0x87   : > { %817 = vmatprep.subr.bf16.mxu0 %v1099_v0  ;;  %843 = vmatprep.subr.bf16.mxu1 %v1099_v0 }
  0x8a   : > { %819 = vmatpush1.bf16.msra.mxu0 %v818_v38  ;;  %859 = vmatpush1.bf16.msra.mxu1 %v818_v38 }
  0x8b   : > { %820 = vmatprep.subr.bf16.mxu0 %v1099_v0  ;;  %844 = vmatprep.subr.bf16.mxu1 %v1099_v0 }
  0x8e   : > { %822 = vmatpush1.bf16.msra.mxu0 %v821_v41  ;;  %860 = vmatpush1.bf16.msra.mxu1 %v821_v41 }
  0x8f   : > { %823 = vmatprep.subr.bf16.mxu0 %v1099_v0  ;;  %845 = vmatprep.subr.bf16.mxu1 %v1099_v0 }
  0x92   : > { %825 = vmatpush1.bf16.msra.mxu0 %v824_v44  ;;  %861 = vmatpush1.bf16.msra.mxu1 %v824_v44 }
  0x93   : > { %826 = vmatprep.subr.bf16.mxu0 %v1099_v0  ;;  %846 = vmatprep.subr.bf16.mxu1 %v1099_v0 }
  0x96   : > { %828 = vmatpush1.bf16.msra.mxu0 %v827_v47  ;;  %862 = vmatpush1.bf16.msra.mxu1 %v827_v47 }
  0x97   : > { %829 = vmatprep.subr.bf16.mxu0 %v1099_v0  ;;  %847 = vmatprep.subr.bf16.mxu1 %v1099_v0  ;;  %v327_v0 = vld [vmem:[%s1273_s26 + $0xd0] sm:$0xff] }
  0x9a   : > { %831 = vmatpush1.bf16.msra.mxu0 %v830_v50  ;;  %863 = vmatpush1.bf16.msra.mxu1 %v830_v50 }
  0x9d   : > { %436 = vmatmul.mubr.f32.vlgmr.msra.gmra.mrb[0].mxu0 %v301_v51  ;;  %486 = vmatmul.mubr.f32.vlgmr.msra.gmra.mrb[0].mxu1 %v321_v52 }
  0x9e   : > { %440 = vmatprep.mubr.f32.mxu0 %v304_v53  ;;  %490 = vmatprep.mubr.f32.mxu1 %v324_v54 }
  0xa1   : > { %441 = vmatmul.mubr.f32.gmra.mrb[2].mxu0 %v303_v55  ;;  %491 = vmatmul.mubr.f32.gmra.mrb[2].mxu1 %v323_v56 }
  0xa2   : > { %445 = vmatprep.mubr.f32.mxu0 %v306_v57  ;;  %495 = vmatprep.mubr.f32.mxu1 %v326_v58 }
  0xa5   : > { %446 = vmatmul.mubr.f32.gmra.mrb[4].mxu0 %v305_v59  ;;  %496 = vmatmul.mubr.f32.gmra.mrb[4].mxu1 %v325_v60 }
  0xa6   : > { %450 = vmatprep.mubr.f32.mxu0 %v308_v61  ;;  %500 = vmatprep.mubr.f32.mxu1 %v328_v62 }
  0xa9   : > { %451 = vmatmul.mubr.f32.gmra.mrb[6].mxu0 %v307_v63  ;;  %501 = vmatmul.mubr.f32.gmra.mrb[6].mxu1 %v327_v0 }
  0xaa   : > { %455 = vmatprep.mubr.f32.mxu0 %v310_v1  ;;  %505 = vmatprep.mubr.f32.mxu1 %v330_v2 }
  0xad   : > { %456 = vmatmul.mubr.f32.gmra.mrb[8].mxu0 %v309_v3  ;;  %506 = vmatmul.mubr.f32.gmra.mrb[8].mxu1 %v329_v4 }
  0xae   : > { %460 = vmatprep.mubr.f32.mxu0 %v312_v5  ;;  %510 = vmatprep.mubr.f32.mxu1 %v332_v6 }
  0xb1   : > { %461 = vmatmul.mubr.f32.gmra.mrb[10].mxu0 %v311_v7  ;;  %511 = vmatmul.mubr.f32.gmra.mrb[10].mxu1 %v331_v8 }
  0xb2   : > { %465 = vmatprep.mubr.f32.mxu0 %v314_v9  ;;  %515 = vmatprep.mubr.f32.mxu1 %v334_v10 }
  0xb5   : > { %466 = vmatmul.mubr.f32.gmra.mrb[12].mxu0 %v313_v11  ;;  %516 = vmatmul.mubr.f32.gmra.mrb[12].mxu1 %v333_v12 }
  0xb6   : > { %470 = vmatprep.mubr.f32.mxu0 %v316_v13  ;;  %520 = vmatprep.mubr.f32.mxu1 %v336_v14 }
  0xb9   : > { %471 = vmatmul.mubr.f32.gmra.mrb[14].mxu0 %v315_v15  ;;  %521 = vmatmul.mubr.f32.gmra.mrb[14].mxu1 %v335_v16 }
  0xba   : > { %475 = vmatprep.mubr.f32.mxu0 %v318_v17  ;;  %525 = vmatprep.mubr.f32.mxu1 %v338_v18 }
  0xbd   : > { %476 = vmatmul.mubr.f32.gmra.mrb[16].mxu0 %v317_v19  ;;  %526 = vmatmul.mubr.f32.gmra.mrb[16].mxu1 %v337_v20 }
  0xbe   : > { %480 = vmatprep.mubr.f32.mxu0 %v320_v21 }
  0xc1   : > { %481 = vmatmul.mubr.f32.gmra.mrb[18].mxu0 %v319_v22 }
 0x170   : > { %v437_v24 = vpop.f32.mrb[0].mxu0  ;;  %v487_v25 = vpop.f32.mrb[0].mxu1 }
 0x171   : > { %v598_v26 = vadd.f32 %v1357_v23, %v437_v24  ;;  %v439_v27 = vpop.f32.mrb[1].mxu0  ;;  %v608_v28 = vadd.f32 %v1357_v23, %v487_v25  ;;  %v489_v29 = vpop.f32.mrb[1].mxu1 }
 0x173   : > { %617 = vst [vmem:[%s1361_s7] sm:$0xff] %v598_v26  ;;  %627 = vst [vmem:[%s1361_s7 + $0x50] sm:$0xff] %v608_v28 }
 0x174   : > { %v442_v30 = vpop.f32.mrb[2].mxu0  ;;  %v492_v31 = vpop.f32.mrb[2].mxu1 }
 0x175   : > { %v599_v32 = vadd.f32 %v1357_v23, %v442_v30  ;;  %v444_v33 = vpop.f32.mrb[3].mxu0  ;;  %v609_v34 = vadd.f32 %v1357_v23, %v492_v31  ;;  %v494_v35 = vpop.f32.mrb[3].mxu1 }
 0x177   : > { %618 = vst [vmem:[%s1361_s7 + $0x8] sm:$0xff] %v599_v32  ;;  %628 = vst [vmem:[%s1361_s7 + $0x58] sm:$0xff] %v609_v34 }
 0x178   : > { %v447_v36 = vpop.f32.mrb[4].mxu0  ;;  %v497_v37 = vpop.f32.mrb[4].mxu1 }
 0x179   : > { %v600_v38 = vadd.f32 %v1357_v23, %v447_v36  ;;  %v449_v39 = vpop.f32.mrb[5].mxu0  ;;  %v610_v40 = vadd.f32 %v1357_v23, %v497_v37  ;;  %v499_v41 = vpop.f32.mrb[5].mxu1 }
 0x17b   : > { %619 = vst [vmem:[%s1361_s7 + $0x10] sm:$0xff] %v600_v38  ;;  %629 = vst [vmem:[%s1361_s7 + $0x60] sm:$0xff] %v610_v40 }
 0x17c   : > { %v452_v42 = vpop.f32.mrb[6].mxu0  ;;  %v502_v43 = vpop.f32.mrb[6].mxu1 }
 0x17d   : > { %v601_v44 = vadd.f32 %v1357_v23, %v452_v42  ;;  %v454_v45 = vpop.f32.mrb[7].mxu0  ;;  %v611_v46 = vadd.f32 %v1357_v23, %v502_v43  ;;  %v504_v47 = vpop.f32.mrb[7].mxu1 }
 0x17f   : > { %620 = vst [vmem:[%s1361_s7 + $0x18] sm:$0xff] %v601_v44  ;;  %630 = vst [vmem:[%s1361_s7 + $0x68] sm:$0xff] %v611_v46 }
 0x180   : > { %v457_v48 = vpop.f32.mrb[8].mxu0  ;;  %v507_v49 = vpop.f32.mrb[8].mxu1 }
 0x181   : > { %v602_v50 = vadd.f32 %v1357_v23, %v457_v48  ;;  %v459_v51 = vpop.f32.mrb[9].mxu0  ;;  %v612_v52 = vadd.f32 %v1357_v23, %v507_v49  ;;  %v509_v53 = vpop.f32.mrb[9].mxu1 }
 0x183   : > { %621 = vst [vmem:[%s1361_s7 + $0x20] sm:$0xff] %v602_v50  ;;  %631 = vst [vmem:[%s1361_s7 + $0x70] sm:$0xff] %v612_v52 }
 0x184   : > { %v462_v54 = vpop.f32.mrb[10].mxu0  ;;  %v512_v55 = vpop.f32.mrb[10].mxu1 }
 0x185   : > { %v603_v56 = vadd.f32 %v1357_v23, %v462_v54  ;;  %v464_v57 = vpop.f32.mrb[11].mxu0  ;;  %v613_v58 = vadd.f32 %v1357_v23, %v512_v55  ;;  %v514_v59 = vpop.f32.mrb[11].mxu1 }
 0x187   : > { %622 = vst [vmem:[%s1361_s7 + $0x28] sm:$0xff] %v603_v56  ;;  %632 = vst [vmem:[%s1361_s7 + $0x78] sm:$0xff] %v613_v58 }
 0x188   : > { %v467_v60 = vpop.f32.mrb[12].mxu0  ;;  %v517_v61 = vpop.f32.mrb[12].mxu1 }
 0x189   : > { %v604_v62 = vadd.f32 %v1357_v23, %v467_v60  ;;  %v469_v63 = vpop.f32.mrb[13].mxu0  ;;  %v614_v0 = vadd.f32 %v1357_v23, %v517_v61  ;;  %v519_v1 = vpop.f32.mrb[13].mxu1 }
 0x18b   : > { %623 = vst [vmem:[%s1361_s7 + $0x30] sm:$0xff] %v604_v62  ;;  %633 = vst [vmem:[%s1361_s7 + $0x80] sm:$0xff] %v614_v0 }
 0x18c   : > { %v472_v2 = vpop.f32.mrb[14].mxu0  ;;  %v522_v3 = vpop.f32.mrb[14].mxu1 }
 0x18d   : > { %v605_v4 = vadd.f32 %v1357_v23, %v472_v2  ;;  %v474_v5 = vpop.f32.mrb[15].mxu0  ;;  %v615_v6 = vadd.f32 %v1357_v23, %v522_v3  ;;  %v524_v7 = vpop.f32.mrb[15].mxu1 }
 0x18f   : > { %624 = vst [vmem:[%s1361_s7 + $0x38] sm:$0xff] %v605_v4  ;;  %634 = vst [vmem:[%s1361_s7 + $0x88] sm:$0xff] %v615_v6 }
 0x190   : > { %v477_v8 = vpop.f32.mrb[16].mxu0  ;;  %v527_v9 = vpop.f32.mrb[16].mxu1 }
 0x191   : > { %v606_v10 = vadd.f32 %v1357_v23, %v477_v8  ;;  %v479_v11 = vpop.f32.mrb[17].mxu0  ;;  %v616_v12 = vadd.f32 %v1357_v23, %v527_v9  ;;  %v529_v13 = vpop.f32.mrb[17].mxu1 }
 0x193   : > { %625 = vst [vmem:[%s1361_s7 + $0x40] sm:$0xff] %v606_v10  ;;  %635 = vst [vmem:[%s1361_s7 + $0x90] sm:$0xff] %v616_v12 }
 0x194   : > { %v482_v14 = vpop.f32.mrb[18].mxu0 }
 0x195   : > { %v607_v15 = vadd.f32 %v1357_v23, %v482_v14  ;;  %v484_v16 = vpop.f32.mrb[19].mxu0 }
 0x197   : > { %626 = vst [vmem:[%s1361_s7 + $0x48] sm:$0xff] %v607_v15 }
 0x198   : > { %1018 = shalt.err (!%p1015_p5)
}
 0x199   : > { %s1019_s30 = scalar_lea.hbm %s1402_s6, 2432  ;;  %s1023_s20 = scalar_lea.hbm %s1458_s3, 4864 }
 0x19a   : > { %p1020_p9 = scmp.ne.s32.totalorder %s1402_s6, %s1019_s30  ;;  %p1024_p3 = scmp.lt.u32.totalorder %s1402_s6, %s1458_s3 }
 0x19b   : > { %p1025_p7 = scmp.lt.u32.totalorder %s1023_s20, %s1019_s30  ;;  %p1027_p4 = scmp.lt.u32.totalorder %s1019_s30, %s1402_s6 }
 0x19c   : > { %p1021_p1 = pnand %p1020_p9, %p1215_p10 }
 0x19d   : > { %p1026_p11 = por %p1025_p7, %p1024_p3 }
 0x19e   : > { %p1022_p2 = pneg %p1021_p1 }
 0x19f   : > { %p1028_p6 = por %p1027_p4, %p1026_p11 }
 0x1a1   : > { %p1029_p8 = pnand %p1028_p6, %p1022_p2 }
 0x1a3   : > { %1032 = shalt.err (!%p1029_p8)
}
 0x1a4   : > { %s1101_s7 = smov 128   ;;  %s1102_s8 = smov 8  }
 0x1a5   : > { %873 = dma.vmem_to_hbm [thread:$0]  (%p1215_p10), %s1404_s10, 2432, %s1402_s6, %s637_s15, %s1101_s7, %s1101_s7, %s1102_s8  }
 0x1a6 PF: > { %s666_s11 = sand.u32 1, %s1071_s12   ;;  %p1475_p12 = scmp.ne.s32.totalorder %s1466_s23, 0 }
 0x1a7   : > { %p1476_p13 = scmp.ge.s32.totalorder %s1091_s17, 2  ;;  %s667_s27 = scalar_lea.sflag [#allocation5], %s666_s11 }
 0x1a9   : > { %p884_p0 = pnand %p1476_p13, %p1475_p12 }
 0x1ab   : > { %1066 = dma.done.wait (!%p884_p0), %s667_s27, 2432  }
 0x1ac   : > { %1068 = vsyncadd (!%p884_p0), %s667_s27, 4294964864  ;;  %s20_s17 = sadd.s32 1, %s1091_s17   ;;  %s1477_s12 = smov %s1075_s13 }
 0x1ad   : > { %p17_p5 = scmp.ge.s32.totalorder %s20_s17, 4   ;;  %s1478_s13 = smov %s1079_s14 }
 0x1ae   : > { %s1479_s14 = smov %s1224_s5  ;;  %s1480_s15 = smov %s1087_s16 }
 0x1af   : > { %s1481_s16 = smov %s1483_s28  ;;  %19 = sbr.rel (!%p17_p5) target bundleno = 7 (0x7), region = 93 }
 0x1b6   :  { %672 = vsyncpa [#allocation4], 1 }
 0x1b7   :  { %674 = vsyncpa [#allocation4 + $0x1], 1 }
 0x1b8   :  { %675 = vsyncpa [#allocation7], 1 }
 0x1b9   :  { %676 = vsyncpa [#allocation5], 1 }
 0x1ba   :  { %678 = vsyncpa [#allocation5 + $0x1], 1 }

// kernel: tpu_custom_call.1
= control target key start
LH: loop header
LB: loop body
LE: loop exit
PB: predicated region body
PF: predicated region fallthrough
CT: control target
= control target key end

     0   :  { %8 = vsyncpa [#allocation4], 0  ;;  %s1455_s0 = inlined_call_operand.hbm [shape: f32[300,256], index: 0, kind: input, shape index: {}]   ;;  %s1456_s1 = inlined_call_operand.hbm [shape: f32[256,128], index: 1, kind: input, shape index: {}]   ;;  %s1457_s2 = inlined_call_operand.vmem [shape: f32[1,128], index: 2, kind: input, shape index: {}]   ;;  %s1458_s3 = inlined_call_operand.hbm [shape: f32[300,128], index: 3, kind: output, shape index: {}]  }
   0x1   :  { %10 = vsyncpa [#allocation4 + $0x1], 0 }
   0x2   :  { %11 = vsyncpa [#allocation7], 0 }
   0x3   :  { %12 = vsyncpa [#allocation5], 0 }
   0x4   :  { %14 = vsyncpa [#allocation5 + $0x1], 0  ;;  %s1123_s12 = smov 0   ;;  %s1125_s13 = smov 0  }
   0x5   :  { %s1127_s14 = smov 0   ;;  %s1129_s15 = smov 0  }
   0x6   :  { %s1131_s16 = smov 0   ;;  %s1133_s17 = smov 0  }
   0x7 LB: > { %s766_s18 = sadd.s32 4294967295, %s1091_s17   ;;  %s767_s19 = sadd.s32 4294967294, %s1091_s17   ;;  %s1091_s17 = sphi %s1133_s17, %s20_s17   ;;  %s1087_s16 = sphi %s1131_s16, %s1481_s16   ;;  %s1083_s15 = sphi %s1129_s15, %s1480_s15   ;;  %s1079_s14 = sphi %s1127_s14, %s1479_s14   ;;  %s1075_s13 = sphi %s1125_s13, %s1478_s13   ;;  %s1071_s12 = sphi %s1123_s12, %s1477_s12  }
   0x8   : > { %p61_p0 = scmp.ne.s32.totalorder %s1075_s13, %s1071_s12  ;;  %p1157_p1 = scmp.eq.s32.totalorder %s766_s18, 0 }
   0x9   : > { %p1161_p2 = scmp.eq.s32.totalorder %s766_s18, 1  ;;  %p147_p3 = scmp.eq.s32.totalorder %s767_s19, 1 }
   0xa   : > { %s1463_s20 = scalar_select %p1157_p1, 1, 0 }
   0xb   : > { %s1464_s21 = scalar_select %p1161_p2, 1, 0 }
   0xc   : > { %p1167_p4 = por %p1157_p1, %p61_p0  ;;  %p768_p5 = scmp.ge.s32.totalorder %s1091_s17, 1 }
   0xd   : > { %p1172_p6 = por %p147_p3, %p61_p0  ;;  %p154_p7 = scmp.lt.s32.totalorder %s1091_s17, 3 }
   0xe   : > { %s1465_s22 = scalar_select %p1167_p4, 1, 0 }
   0xf   : > { %s1466_s23 = scalar_select %p1172_p6, 1, 0 }
  0x10   : > { %p1177_p8 = pnand %p768_p5, %p154_p7  ;;  %s1093_s25 = smov [#allocation6]  }
  0x11   : > { %s170_s26 = sshll.u32 %s1093_s25, 4  ;;  %s39_s28 = sadd.s32 1, %s1087_s16  ;;  %s171_s26 = int_to_ptr.vmem [resolvable:$true] %s170_s26 }
  0x12   : > { %s1467_s24 = scalar_select %p1177_p8, 1, 0 }
  0x13   : > { %p875_p9 = pneg %p1177_p8  ;;  %s947_s4 = scalar_lea.hbm %s1456_s1, 4096 }
  0x14   : > { %p948_p12 = scmp.ne.s32.totalorder %s1456_s1, %s947_s4  ;;  %p954_p5 = scmp.lt.u32.totalorder %s947_s4, %s1456_s1 }
  0x15   : > { %p1186_p11 = pnand %p875_p9, %p1157_p1 }
  0x17   : > { %p949_p13 = pneg %p1186_p11 }
  0x19   : > { %p950_p0 = pnand %p949_p13, %p948_p12 }
  0x1b   : > { %p951_p3 = pneg %p950_p0 }
  0x1d   : > { %p956_p7 = pnand %p954_p5, %p951_p3 }
  0x1f   : > { %959 = shalt.err (!%p956_p7)
}
  0x20   : > { %s960_s9 = scalar_lea.vmem %s171_s26, 4096  ;;  %p968_p1 = scmp.lt.s32.totalorder %s171_s26, %s171_s26 }
  0x21   : > { %p961_p9 = scmp.ne.s32.totalorder %s171_s26, %s960_s9  ;;  %p969_p4 = scmp.lt.s32.totalorder %s960_s9, %s960_s9 }
  0x23   : > { %p963_p10 = pnand %p961_p9, %p949_p13  ;;  %p970_p8 = por %p969_p4, %p968_p1 }
  0x25   : > { %p964_p6 = pneg %p963_p10 }
  0x27   : > { %p971_p2 = pnand %p970_p8, %p964_p6 }
  0x29   : > { %974 = shalt.err (!%p971_p2)
}
  0x2a   : > { %s1094_s10 = smov 128   ;;  %s1095_s11 = smov 8  }
  0x2b   : > { %878 = dma.hbm_to_vmem [thread:$0]  (!%p1186_p11), %s1456_s1, 4096, %s171_s26, [#allocation7], %s1094_s10, %s1094_s10, %s1095_s11  }
  0x2c   : > { %p41_p1 = scmp.ge.s32.totalorder %s39_s28, 2  ;;  %s48_s25 = sadd.s32 1, %s1079_s14 }
  0x2d   : > { %p55_p2 = scmp.ne.s32.totalorder %s1079_s14, %s1075_s13  ;;  %p56_p4 = scmp.eq.s32.totalorder %s1091_s17, 0 }
  0x2e   : > { %s1483_s28 = smov (%p41_p1, %s39_s28), 0  ;;  %p1469_p8 = scmp.ne.s32.totalorder %s1464_s21, 0 }
  0x2f   : > { %p57_p6 = por %p56_p4, %p55_p2  ;;  %s43_s30 = ssub.s32 %s1087_s16, %s1483_s28 }
  0x30   : > { %p1215_p10 = por %p1469_p8, %p55_p2  ;;  %p888_p12 = scmp.lt.s32.totalorder %s1091_s17, 2 }
  0x31   : > { %p46_p13 = scmp.eq.s32.totalorder %s43_s30, 0  ;;  %s190_s27 = sand.u32 1, %s1079_s14  }
  0x32   : > { %s864_s4 = smul.u32 304, %s190_s27  ;;  %p1227_p11 = pnand %p888_p12, %p57_p6 }
  0x33   : > { %s1224_s5 = scalar_select %p46_p13, %s1079_s14, %s48_s25  }
  0x34   : > { %s783_s26 = smul.u32 4864, %s1087_s16  ;;  %s194_s6 = scalar_lea.vmem [#allocation3], %s864_s4 }
  0x35   : > { %s204_s7 = sshll.u32 %s194_s6, 4  ;;  %s1238_s11 = scalar_lea.sflag [#allocation4], %s190_s27  ;;  %s1236_s7 = int_to_ptr.vmem [resolvable:$true] %s204_s7 }
  0x36   : > { %s1234_s10 = scalar_lea.hbm %s1455_s0, %s783_s26  ;;  %p977_p3 = pneg %p1227_p11 }
  0x37   : > { %s975_s18 = scalar_lea.hbm %s1234_s10, 4864  ;;  %s980_s30 = scalar_lea.hbm %s1455_s0, 9728 }
  0x38   : > { %p976_p0 = scmp.ne.s32.totalorder %s1234_s10, %s975_s18  ;;  %p981_p9 = scmp.lt.u32.totalorder %s1234_s10, %s1455_s0 }
  0x39   : > { %p982_p1 = scmp.lt.u32.totalorder %s980_s30, %s975_s18  ;;  %p984_p4 = scmp.lt.u32.totalorder %s975_s18, %s1234_s10 }
  0x3a   : > { %p978_p5 = pnand %p977_p3, %p976_p0 }
  0x3b   : > { %p983_p2 = por %p982_p1, %p981_p9 }
  0x3c   : > { %p979_p7 = pneg %p978_p5 }
  0x3d   : > { %p985_p6 = por %p984_p4, %p983_p2 }
  0x3f   : > { %p986_p8 = pnand %p985_p6, %p979_p7 }
  0x41   : > { %989 = shalt.err (!%p986_p8)
}
  0x42   : > { %s990_s27 = scalar_lea.vmem %s1236_s7, 4864  ;;  %s1096_s6 = smov [#allocation3]  }
  0x43   : > { %p991_p12 = scmp.ne.s32.totalorder %s1236_s7, %s990_s27  ;;  %s995_s9 = sshll.u32 %s1096_s6, 4  ;;  %s996_s9 = int_to_ptr.vmem [resolvable:$false] %s995_s9 }
  0x44   : > { %s997_s21 = scalar_lea.vmem %s996_s9, 9728  ;;  %p998_p5 = scmp.lt.s32.totalorder %s1236_s7, %s996_s9 }
  0x45   : > { %p993_p13 = pnand %p991_p12, %p977_p3  ;;  %p999_p9 = scmp.lt.s32.totalorder %s997_s21, %s990_s27 }
  0x47   : > { %p994_p0 = pneg %p993_p13  ;;  %p1000_p1 = por %p999_p9, %p998_p5 }
  0x49   : > { %p1001_p2 = pnand %p1000_p1, %p994_p0 }
  0x4b   : > { %1004 = shalt.err (!%p1001_p2)
}
  0x4c   : > { %s1097_s18 = smov 256   ;;  %s1098_s19 = smov 16  }
  0x4d   : > { %882 = dma.hbm_to_vmem [thread:$0]  (!%p1227_p11), %s1234_s10, 4864, %s1236_s7, %s1238_s11, %s1097_s18, %s1097_s18, %s1098_s19  }
  0x4e   : > { %p1472_p3 = scmp.ne.s32.totalorder %s1467_s24, 0 }
  0x4f   : > { %s1269_s25 = sand.u32 (!%p1472_p3), 1, %s1075_s13   ;;  %p1473_p7 = scmp.ne.s32.totalorder (!%p1472_p3), %s1465_s22, 0 }
  0x50   : > { %216 = sbr.rel (%p1472_p3) target bundleno = 422 (0x1a6), region = 32  ;;  %s219_s4 = scalar_lea.sflag (!%p1472_p3), [#allocation4], %s1269_s25 }
  0x51   : > { %s865_s30 = smul.u32 (!%p1472_p3), 304, %s1269_s25 }
  0x53   : > { %s1273_s26 = scalar_lea.vmem (!%p1472_p3), [#allocation3], %s865_s30 }
  0x57   : > { %1058 = dma.done.wait (%p1473_p7), %s219_s4, 4864  }
  0x58   : > { %1060 = vsyncadd (%p1473_p7), %s219_s4, 4294962432  ;;  %p1474_p11 = scmp.ne.s32.totalorder %s1463_s20, 0 }
  0x5a   : > { %1062 = dma.done.wait (%p1474_p11), [#allocation7], 4096  }
  0x5b   : > { %1064 = vsyncadd (%p1474_p11), [#allocation7], 4294963200  ;;  %v1099_v0 = vmov 0.0|0.0   ;;  %v339_v1 = vld [vmem:[#allocation6] sm:$0xff]  ;;  %v340_v2 = vld [vmem:[#allocation6 + $0x8] sm:$0xff]  ;;  %s866_s20 = smul.u32 152, %s1269_s25 }
  0x5c   : > { %784 = vmatprep.subr.bf16.mxu0 %v1099_v0  ;;  %832 = vmatprep.subr.bf16.mxu1 %v1099_v0  ;;  %v341_v3 = vld [vmem:[#allocation6 + $0x10] sm:$0xff]  ;;  %v785_v4 = vpack.c.bf16 %v340_v2, %v339_v1  ;;  %v342_v5 = vld [vmem:[#allocation6 + $0x18] sm:$0xff]  ;;  %v343_v7 = vld [vmem:[#allocation6 + $0x20] sm:$0xff]  ;;  %s782_s8 = smul.u32 2432, %s1083_s15  ;;  %s637_s15 = scalar_lea.sflag [#allocation5], %s1269_s25 }
  0x5d   : > { %v788_v6 = vpack.c.bf16 %v342_v5, %v341_v3  ;;  %v344_v8 = vld [vmem:[#allocation6 + $0x28] sm:$0xff]  ;;  %v345_v10 = vld [vmem:[#allocation6 + $0x30] sm:$0xff]  ;;  %v346_v11 = vld [vmem:[#allocation6 + $0x38] sm:$0xff]  ;;  %s1361_s7 = scalar_lea.vmem [#allocation8], %s866_s20  ;;  %s1100_s21 = smov [#allocation8]  }
  0x5e   : > { %786 = vmatpush1.bf16.msra.mxu0 %v785_v4  ;;  %848 = vmatpush1.bf16.msra.mxu1 %v785_v4  ;;  %v791_v9 = vpack.c.bf16 %v344_v8, %v343_v7  ;;  %v302_v12 = vld [vmem:[%s1273_s26 + $0x8] sm:$0xff]  ;;  %v794_v13 = vpack.c.bf16 %v346_v11, %v345_v10  ;;  %v347_v15 = vld [vmem:[#allocation6 + $0x40] sm:$0xff]  ;;  %v349_v18 = vld [vmem:[#allocation6 + $0x50] sm:$0xff]  ;;  %s651_s10 = sshll.u32 %s1361_s7, 4  ;;  %s1402_s6 = scalar_lea.hbm %s1458_s3, %s782_s8  ;;  %s1404_s10 = int_to_ptr.vmem [resolvable:$true] %s651_s10 }
  0x5f   : > { %787 = vmatprep.subr.bf16.mxu0 %v1099_v0  ;;  %833 = vmatprep.subr.bf16.mxu1 %v1099_v0  ;;  %v322_v14 = vld [vmem:[%s1273_s26 + $0xa8] sm:$0xff]  ;;  %v351_v21 = vld [vmem:[#allocation6 + $0x60] sm:$0xff]  ;;  %v353_v24 = vld [vmem:[#allocation6 + $0x70] sm:$0xff]  ;;  %s1005_s9 = scalar_lea.vmem %s1404_s10, 2432  ;;  %s1009_s18 = sshll.u32 %s1100_s21, 4  ;;  %s1010_s18 = int_to_ptr.vmem [resolvable:$false] %s1009_s18 }
  0x60   : > { %v348_v16 = vld [vmem:[#allocation6 + $0x48] sm:$0xff]  ;;  %435 = vmatprep.mubr.f32.mxu0 %v302_v12  ;;  %485 = vmatprep.mubr.f32.mxu1 %v322_v14  ;;  %v350_v19 = vld [vmem:[#allocation6 + $0x58] sm:$0xff]  ;;  %v355_v27 = vld [vmem:[#allocation6 + $0x80] sm:$0xff]  ;;  %p1006_p4 = scmp.ne.s32.totalorder %s1404_s10, %s1005_s9  ;;  %s1011_s19 = scalar_lea.vmem %s1010_s18, 4864 }
  0x61   : > { %v797_v17 = vpack.c.bf16 %v348_v16, %v347_v15  ;;  %v800_v20 = vpack.c.bf16 %v350_v19, %v349_v18  ;;  %v352_v22 = vld [vmem:[#allocation6 + $0x68] sm:$0xff]  ;;  %v354_v25 = vld [vmem:[#allocation6 + $0x78] sm:$0xff]  ;;  %v357_v30 = vld [vmem:[#allocation6 + $0x90] sm:$0xff]  ;;  %p1012_p12 = scmp.lt.s32.totalorder %s1404_s10, %s1010_s18  ;;  %p1013_p13 = scmp.lt.s32.totalorder %s1011_s19, %s1005_s9 }
  0x62   : > { %789 = vmatpush1.bf16.msra.mxu0 %v788_v6  ;;  %849 = vmatpush1.bf16.msra.mxu1 %v788_v6  ;;  %v803_v23 = vpack.c.bf16 %v352_v22, %v351_v21  ;;  %v806_v26 = vpack.c.bf16 %v354_v25, %v353_v24  ;;  %v356_v28 = vld [vmem:[#allocation6 + $0x88] sm:$0xff]  ;;  %v358_v31 = vld [vmem:[#allocation6 + $0x98] sm:$0xff]  ;;  %v359_v33 = vld [vmem:[#allocation6 + $0xa0] sm:$0xff]  ;;  %p1007_p6 = pnand %p1006_p4, %p1215_p10 }
  0x63   : > { %790 = vmatprep.subr.bf16.mxu0 %v1099_v0  ;;  %834 = vmatprep.subr.bf16.mxu1 %v1099_v0  ;;  %v809_v29 = vpack.c.bf16 %v356_v28, %v355_v27  ;;  %v812_v32 = vpack.c.bf16 %v358_v31, %v357_v30  ;;  %v360_v34 = vld [vmem:[#allocation6 + $0xa8] sm:$0xff]  ;;  %v361_v36 = vld [vmem:[#allocation6 + $0xb0] sm:$0xff]  ;;  %v362_v37 = vld [vmem:[#allocation6 + $0xb8] sm:$0xff]  ;;  %p1014_p0 = por %p1013_p13, %p1012_p12 }
  0x64   : > { %v815_v35 = vpack.c.bf16 %v360_v34, %v359_v33  ;;  %v818_v38 = vpack.c.bf16 %v362_v37, %v361_v36  ;;  %v363_v39 = vld [vmem:[#allocation6 + $0xc0] sm:$0xff]  ;;  %v364_v40 = vld [vmem:[#allocation6 + $0xc8] sm:$0xff]  ;;  %v365_v42 = vld [vmem:[#allocation6 + $0xd0] sm:$0xff]  ;;  %p1008_p8 = pneg %p1007_p6 }
  0x65   : > { %v821_v41 = vpack.c.bf16 %v364_v40, %v363_v39  ;;  %v366_v43 = vld [vmem:[#allocation6 + $0xd8] sm:$0xff]  ;;  %v367_v45 = vld [vmem:[#allocation6 + $0xe0] sm:$0xff]  ;;  %v368_v46 = vld [vmem:[#allocation6 + $0xe8] sm:$0xff] }
  0x66   : > { %792 = vmatpush1.bf16.msra.mxu0 %v791_v9  ;;  %850 = vmatpush1.bf16.msra.mxu1 %v791_v9  ;;  %v824_v44 = vpack.c.bf16 %v366_v43, %v365_v42  ;;  %v827_v47 = vpack.c.bf16 %v368_v46, %v367_v45  ;;  %v369_v48 = vld [vmem:[#allocation6 + $0xf0] sm:$0xff]  ;;  %v370_v49 = vld [vmem:[#allocation6 + $0xf8] sm:$0xff]  ;;  %p1015_p5 = pnand %p1014_p0, %p1008_p8 }
  0x67   : > { %793 = vmatprep.subr.bf16.mxu0 %v1099_v0  ;;  %835 = vmatprep.subr.bf16.mxu1 %v1099_v0  ;;  %v830_v50 = vpack.c.bf16 %v370_v49, %v369_v48  ;;  %v301_v51 = vld [vmem:[%s1273_s26] sm:$0xff]  ;;  %v304_v53 = vld [vmem:[%s1273_s26 + $0x18] sm:$0xff]  ;;  %v303_v55 = vld [vmem:[%s1273_s26 + $0x10] sm:$0xff] }
  0x68   : > { %v321_v52 = vld [vmem:[%s1273_s26 + $0xa0] sm:$0xff]  ;;  %v324_v54 = vld [vmem:[%s1273_s26 + $0xb8] sm:$0xff]  ;;  %v323_v56 = vld [vmem:[%s1273_s26 + $0xb0] sm:$0xff] }
  0x69   : > { %v306_v57 = vld [vmem:[%s1273_s26 + $0x28] sm:$0xff]  ;;  %v305_v59 = vld [vmem:[%s1273_s26 + $0x20] sm:$0xff]  ;;  %v308_v61 = vld [vmem:[%s1273_s26 + $0x38] sm:$0xff] }
  0x6a   : > { %795 = vmatpush1.bf16.msra.mxu0 %v794_v13  ;;  %851 = vmatpush1.bf16.msra.mxu1 %v794_v13  ;;  %v326_v58 = vld [vmem:[%s1273_s26 + $0xc8] sm:$0xff]  ;;  %v325_v60 = vld [vmem:[%s1273_s26 + $0xc0] sm:$0xff]  ;;  %v328_v62 = vld [vmem:[%s1273_s26 + $0xd8] sm:$0xff] }
  0x6b   : > { %796 = vmatprep.subr.bf16.mxu0 %v1099_v0  ;;  %836 = vmatprep.subr.bf16.mxu1 %v1099_v0  ;;  %v307_v63 = vld [vmem:[%s1273_s26 + $0x30] sm:$0xff]  ;;  %v310_v1 = vld [vmem:[%s1273_s26 + $0x48] sm:$0xff]  ;;  %v309_v3 = vld [vmem:[%s1273_s26 + $0x40] sm:$0xff] }
  0x6c   : > { %v330_v2 = vld [vmem:[%s1273_s26 + $0xe8] sm:$0xff]  ;;  %v329_v4 = vld [vmem:[%s1273_s26 + $0xe0] sm:$0xff]  ;;  %v312_v5 = vld [vmem:[%s1273_s26 + $0x58] sm:$0xff] }
  0x6d   : > { %v332_v6 = vld [vmem:[%s1273_s26 + $0xf8] sm:$0xff]  ;;  %v311_v7 = vld [vmem:[%s1273_s26 + $0x50] sm:$0xff]  ;;  %v314_v9 = vld [vmem:[%s1273_s26 + $0x68] sm:$0xff] }
  0x6e   : > { %798 = vmatpush1.bf16.msra.mxu0 %v797_v17  ;;  %852 = vmatpush1.bf16.msra.mxu1 %v797_v17  ;;  %v331_v8 = vld [vmem:[%s1273_s26 + $0xf0] sm:$0xff]  ;;  %v334_v10 = vld [vmem:[%s1273_s26 + $0x108] sm:$0xff]  ;;  %v313_v11 = vld [vmem:[%s1273_s26 + $0x60] sm:$0xff] }
  0x6f   : > { %799 = vmatprep.subr.bf16.mxu0 %v1099_v0  ;;  %837 = vmatprep.subr.bf16.mxu1 %v1099_v0  ;;  %v333_v12 = vld [vmem:[%s1273_s26 + $0x100] sm:$0xff]  ;;  %v316_v13 = vld [vmem:[%s1273_s26 + $0x78] sm:$0xff]  ;;  %v315_v15 = vld [vmem:[%s1273_s26 + $0x70] sm:$0xff] }
  0x70   : > { %v336_v14 = vld [vmem:[%s1273_s26 + $0x118] sm:$0xff]  ;;  %v335_v16 = vld [vmem:[%s1273_s26 + $0x110] sm:$0xff]  ;;  %v318_v17 = vld [vmem:[%s1273_s26 + $0x88] sm:$0xff] }
  0x71   : > { %v338_v18 = vld [vmem:[%s1273_s26 + $0x128] sm:$0xff]  ;;  %v317_v19 = vld [vmem:[%s1273_s26 + $0x80] sm:$0xff]  ;;  %v320_v21 = vld [vmem:[%s1273_s26 + $0x98] sm:$0xff] }
  0x72   : > { %801 = vmatpush1.bf16.msra.mxu0 %v800_v20  ;;  %853 = vmatpush1.bf16.msra.mxu1 %v800_v20  ;;  %v337_v20 = vld [vmem:[%s1273_s26 + $0x120] sm:$0xff]  ;;  %v319_v22 = vld [vmem:[%s1273_s26 + $0x90] sm:$0xff] }
  0x73   : > { %802 = vmatprep.subr.bf16.mxu0 %v1099_v0  ;;  %838 = vmatprep.subr.bf16.mxu1 %v1099_v0 }
  0x76   : > { %804 = vmatpush1.bf16.msra.mxu0 %v803_v23  ;;  %854 = vmatpush1.bf16.msra.mxu1 %v803_v23  ;;  %v1357_v23 = vld [vmem:[%s1457_s2] ss:$0 sm:$0xff] }
  0x77   : > { %805 = vmatprep.subr.bf16.mxu0 %v1099_v0  ;;  %839 = vmatprep.subr.bf16.mxu1 %v1099_v0 }
  0x7a   : > { %807 = vmatpush1.bf16.msra.mxu0 %v806_v26  ;;  %855 = vmatpush1.bf16.msra.mxu1 %v806_v26 }
  0x7b   : > { %808 = vmatprep.subr.bf16.mxu0 %v1099_v0  ;;  %840 = vmatprep.subr.bf16.mxu1 %v1099_v0 }
  0x7e   : > { %810 = vmatpush1.bf16.msra.mxu0 %v809_v29  ;;  %856 = vmatpush1.bf16.msra.mxu1 %v809_v29 }
  0x7f   : > { %811 = vmatprep.subr.bf16.mxu0 %v1099_v0  ;;  %841 = vmatprep.subr.bf16.mxu1 %v1099_v0 }
  0x82   : > { %813 = vmatpush1.bf16.msra.mxu0 %v812_v32  ;;  %857 = vmatpush1.bf16.msra.mxu1 %v812_v32 }
  0x83   : > { %814 = vmatprep.subr.bf16.mxu0 %v1099_v0  ;;  %842 = vmatprep.subr.bf16.mxu1 %v1099_v0 }
  0x86   : > { %816 = vmatpush1.bf16.msra.mxu0 %v815_v35  ;;  %858 = vmatpush1.bf16.msra.mxu1 %v815_v35 }
  0x87   : > { %817 = vmatprep.subr.bf16.mxu0 %v1099_v0  ;;  %843 = vmatprep.subr.bf16.mxu1 %v1099_v0 }
  0x8a   : > { %819 = vmatpush1.bf16.msra.mxu0 %v818_v38  ;;  %859 = vmatpush1.bf16.msra.mxu1 %v818_v38 }
  0x8b   : > { %820 = vmatprep.subr.bf16.mxu0 %v1099_v0  ;;  %844 = vmatprep.subr.bf16.mxu1 %v1099_v0 }
  0x8e   : > { %822 = vmatpush1.bf16.msra.mxu0 %v821_v41  ;;  %860 = vmatpush1.bf16.msra.mxu1 %v821_v41 }
  0x8f   : > { %823 = vmatprep.subr.bf16.mxu0 %v1099_v0  ;;  %845 = vmatprep.subr.bf16.mxu1 %v1099_v0 }
  0x92   : > { %825 = vmatpush1.bf16.msra.mxu0 %v824_v44  ;;  %861 = vmatpush1.bf16.msra.mxu1 %v824_v44 }
  0x93   : > { %826 = vmatprep.subr.bf16.mxu0 %v1099_v0  ;;  %846 = vmatprep.subr.bf16.mxu1 %v1099_v0 }
  0x96   : > { %828 = vmatpush1.bf16.msra.mxu0 %v827_v47  ;;  %862 = vmatpush1.bf16.msra.mxu1 %v827_v47 }
  0x97   : > { %829 = vmatprep.subr.bf16.mxu0 %v1099_v0  ;;  %847 = vmatprep.subr.bf16.mxu1 %v1099_v0  ;;  %v327_v0 = vld [vmem:[%s1273_s26 + $0xd0] sm:$0xff] }
  0x9a   : > { %831 = vmatpush1.bf16.msra.mxu0 %v830_v50  ;;  %863 = vmatpush1.bf16.msra.mxu1 %v830_v50 }
  0x9d   : > { %436 = vmatmul.mubr.f32.vlgmr.msra.gmra.mrb[0].mxu0 %v301_v51  ;;  %486 = vmatmul.mubr.f32.vlgmr.msra.gmra.mrb[0].mxu1 %v321_v52 }
  0x9e   : > { %440 = vmatprep.mubr.f32.mxu0 %v304_v53  ;;  %490 = vmatprep.mubr.f32.mxu1 %v324_v54 }
  0xa1   : > { %441 = vmatmul.mubr.f32.gmra.mrb[2].mxu0 %v303_v55  ;;  %491 = vmatmul.mubr.f32.gmra.mrb[2].mxu1 %v323_v56 }
  0xa2   : > { %445 = vmatprep.mubr.f32.mxu0 %v306_v57  ;;  %495 = vmatprep.mubr.f32.mxu1 %v326_v58 }
  0xa5   : > { %446 = vmatmul.mubr.f32.gmra.mrb[4].mxu0 %v305_v59  ;;  %496 = vmatmul.mubr.f32.gmra.mrb[4].mxu1 %v325_v60 }
  0xa6   : > { %450 = vmatprep.mubr.f32.mxu0 %v308_v61  ;;  %500 = vmatprep.mubr.f32.mxu1 %v328_v62 }
  0xa9   : > { %451 = vmatmul.mubr.f32.gmra.mrb[6].mxu0 %v307_v63  ;;  %501 = vmatmul.mubr.f32.gmra.mrb[6].mxu1 %v327_v0 }
  0xaa   : > { %455 = vmatprep.mubr.f32.mxu0 %v310_v1  ;;  %505 = vmatprep.mubr.f32.mxu1 %v330_v2 }
  0xad   : > { %456 = vmatmul.mubr.f32.gmra.mrb[8].mxu0 %v309_v3  ;;  %506 = vmatmul.mubr.f32.gmra.mrb[8].mxu1 %v329_v4 }
  0xae   : > { %460 = vmatprep.mubr.f32.mxu0 %v312_v5  ;;  %510 = vmatprep.mubr.f32.mxu1 %v332_v6 }
  0xb1   : > { %461 = vmatmul.mubr.f32.gmra.mrb[10].mxu0 %v311_v7  ;;  %511 = vmatmul.mubr.f32.gmra.mrb[10].mxu1 %v331_v8 }
  0xb2   : > { %465 = vmatprep.mubr.f32.mxu0 %v314_v9  ;;  %515 = vmatprep.mubr.f32.mxu1 %v334_v10 }
  0xb5   : > { %466 = vmatmul.mubr.f32.gmra.mrb[12].mxu0 %v313_v11  ;;  %516 = vmatmul.mubr.f32.gmra.mrb[12].mxu1 %v333_v12 }
  0xb6   : > { %470 = vmatprep.mubr.f32.mxu0 %v316_v13  ;;  %520 = vmatprep.mubr.f32.mxu1 %v336_v14 }
  0xb9   : > { %471 = vmatmul.mubr.f32.gmra.mrb[14].mxu0 %v315_v15  ;;  %521 = vmatmul.mubr.f32.gmra.mrb[14].mxu1 %v335_v16 }
  0xba   : > { %475 = vmatprep.mubr.f32.mxu0 %v318_v17  ;;  %525 = vmatprep.mubr.f32.mxu1 %v338_v18 }
  0xbd   : > { %476 = vmatmul.mubr.f32.gmra.mrb[16].mxu0 %v317_v19  ;;  %526 = vmatmul.mubr.f32.gmra.mrb[16].mxu1 %v337_v20 }
  0xbe   : > { %480 = vmatprep.mubr.f32.mxu0 %v320_v21 }
  0xc1   : > { %481 = vmatmul.mubr.f32.gmra.mrb[18].mxu0 %v319_v22 }
 0x170   : > { %v437_v24 = vpop.f32.mrb[0].mxu0  ;;  %v487_v25 = vpop.f32.mrb[0].mxu1 }
 0x171   : > { %v598_v26 = vadd.f32 %v1357_v23, %v437_v24  ;;  %v439_v27 = vpop.f32.mrb[1].mxu0  ;;  %v608_v28 = vadd.f32 %v1357_v23, %v487_v25  ;;  %v489_v29 = vpop.f32.mrb[1].mxu1 }
 0x173   : > { %617 = vst [vmem:[%s1361_s7] sm:$0xff] %v598_v26  ;;  %627 = vst [vmem:[%s1361_s7 + $0x50] sm:$0xff] %v608_v28 }
 0x174   : > { %v442_v30 = vpop.f32.mrb[2].mxu0  ;;  %v492_v31 = vpop.f32.mrb[2].mxu1 }
 0x175   : > { %v599_v32 = vadd.f32 %v1357_v23, %v442_v30  ;;  %v444_v33 = vpop.f32.mrb[3].mxu0  ;;  %v609_v34 = vadd.f32 %v1357_v23, %v492_v31  ;;  %v494_v35 = vpop.f32.mrb[3].mxu1 }
 0x177   : > { %618 = vst [vmem:[%s1361_s7 + $0x8] sm:$0xff] %v599_v32  ;;  %628 = vst [vmem:[%s1361_s7 + $0x58] sm:$0xff] %v609_v34 }
 0x178   : > { %v447_v36 = vpop.f32.mrb[4].mxu0  ;;  %v497_v37 = vpop.f32.mrb[4].mxu1 }
 0x179   : > { %v600_v38 = vadd.f32 %v1357_v23, %v447_v36  ;;  %v449_v39 = vpop.f32.mrb[5].mxu0  ;;  %v610_v40 = vadd.f32 %v1357_v23, %v497_v37  ;;  %v499_v41 = vpop.f32.mrb[5].mxu1 }
 0x17b   : > { %619 = vst [vmem:[%s1361_s7 + $0x10] sm:$0xff] %v600_v38  ;;  %629 = vst [vmem:[%s1361_s7 + $0x60] sm:$0xff] %v610_v40 }
 0x17c   : > { %v452_v42 = vpop.f32.mrb[6].mxu0  ;;  %v502_v43 = vpop.f32.mrb[6].mxu1 }
 0x17d   : > { %v601_v44 = vadd.f32 %v1357_v23, %v452_v42  ;;  %v454_v45 = vpop.f32.mrb[7].mxu0  ;;  %v611_v46 = vadd.f32 %v1357_v23, %v502_v43  ;;  %v504_v47 = vpop.f32.mrb[7].mxu1 }
 0x17f   : > { %620 = vst [vmem:[%s1361_s7 + $0x18] sm:$0xff] %v601_v44  ;;  %630 = vst [vmem:[%s1361_s7 + $0x68] sm:$0xff] %v611_v46 }
 0x180   : > { %v457_v48 = vpop.f32.mrb[8].mxu0  ;;  %v507_v49 = vpop.f32.mrb[8].mxu1 }
 0x181   : > { %v602_v50 = vadd.f32 %v1357_v23, %v457_v48  ;;  %v459_v51 = vpop.f32.mrb[9].mxu0  ;;  %v612_v52 = vadd.f32 %v1357_v23, %v507_v49  ;;  %v509_v53 = vpop.f32.mrb[9].mxu1 }
 0x183   : > { %621 = vst [vmem:[%s1361_s7 + $0x20] sm:$0xff] %v602_v50  ;;  %631 = vst [vmem:[%s1361_s7 + $0x70] sm:$0xff] %v612_v52 }
 0x184   : > { %v462_v54 = vpop.f32.mrb[10].mxu0  ;;  %v512_v55 = vpop.f32.mrb[10].mxu1 }
 0x185   : > { %v603_v56 = vadd.f32 %v1357_v23, %v462_v54  ;;  %v464_v57 = vpop.f32.mrb[11].mxu0  ;;  %v613_v58 = vadd.f32 %v1357_v23, %v512_v55  ;;  %v514_v59 = vpop.f32.mrb[11].mxu1 }
 0x187   : > { %622 = vst [vmem:[%s1361_s7 + $0x28] sm:$0xff] %v603_v56  ;;  %632 = vst [vmem:[%s1361_s7 + $0x78] sm:$0xff] %v613_v58 }
 0x188   : > { %v467_v60 = vpop.f32.mrb[12].mxu0  ;;  %v517_v61 = vpop.f32.mrb[12].mxu1 }
 0x189   : > { %v604_v62 = vadd.f32 %v1357_v23, %v467_v60  ;;  %v469_v63 = vpop.f32.mrb[13].mxu0  ;;  %v614_v0 = vadd.f32 %v1357_v23, %v517_v61  ;;  %v519_v1 = vpop.f32.mrb[13].mxu1 }
 0x18b   : > { %623 = vst [vmem:[%s1361_s7 + $0x30] sm:$0xff] %v604_v62  ;;  %633 = vst [vmem:[%s1361_s7 + $0x80] sm:$0xff] %v614_v0 }
 0x18c   : > { %v472_v2 = vpop.f32.mrb[14].mxu0  ;;  %v522_v3 = vpop.f32.mrb[14].mxu1 }
 0x18d   : > { %v605_v4 = vadd.f32 %v1357_v23, %v472_v2  ;;  %v474_v5 = vpop.f32.mrb[15].mxu0  ;;  %v615_v6 = vadd.f32 %v1357_v23, %v522_v3  ;;  %v524_v7 = vpop.f32.mrb[15].mxu1 }
 0x18f   : > { %624 = vst [vmem:[%s1361_s7 + $0x38] sm:$0xff] %v605_v4  ;;  %634 = vst [vmem:[%s1361_s7 + $0x88] sm:$0xff] %v615_v6 }
 0x190   : > { %v477_v8 = vpop.f32.mrb[16].mxu0  ;;  %v527_v9 = vpop.f32.mrb[16].mxu1 }
 0x191   : > { %v606_v10 = vadd.f32 %v1357_v23, %v477_v8  ;;  %v479_v11 = vpop.f32.mrb[17].mxu0  ;;  %v616_v12 = vadd.f32 %v1357_v23, %v527_v9  ;;  %v529_v13 = vpop.f32.mrb[17].mxu1 }
 0x193   : > { %625 = vst [vmem:[%s1361_s7 + $0x40] sm:$0xff] %v606_v10  ;;  %635 = vst [vmem:[%s1361_s7 + $0x90] sm:$0xff] %v616_v12 }
 0x194   : > { %v482_v14 = vpop.f32.mrb[18].mxu0 }
 0x195   : > { %v607_v15 = vadd.f32 %v1357_v23, %v482_v14  ;;  %v484_v16 = vpop.f32.mrb[19].mxu0 }
 0x197   : > { %626 = vst [vmem:[%s1361_s7 + $0x48] sm:$0xff] %v607_v15 }
 0x198   : > { %1018 = shalt.err (!%p1015_p5)
}
 0x199   : > { %s1019_s30 = scalar_lea.hbm %s1402_s6, 2432  ;;  %s1023_s20 = scalar_lea.hbm %s1458_s3, 4864 }
 0x19a   : > { %p1020_p9 = scmp.ne.s32.totalorder %s1402_s6, %s1019_s30  ;;  %p1024_p3 = scmp.lt.u32.totalorder %s1402_s6, %s1458_s3 }
 0x19b   : > { %p1025_p7 = scmp.lt.u32.totalorder %s1023_s20, %s1019_s30  ;;  %p1027_p4 = scmp.lt.u32.totalorder %s1019_s30, %s1402_s6 }
 0x19c   : > { %p1021_p1 = pnand %p1020_p9, %p1215_p10 }
 0x19d   : > { %p1026_p11 = por %p1025_p7, %p1024_p3 }
 0x19e   : > { %p1022_p2 = pneg %p1021_p1 }
 0x19f   : > { %p1028_p6 = por %p1027_p4, %p1026_p11 }
 0x1a1   : > { %p1029_p8 = pnand %p1028_p6, %p1022_p2 }
 0x1a3   : > { %1032 = shalt.err (!%p1029_p8)
}
 0x1a4   : > { %s1101_s7 = smov 128   ;;  %s1102_s8 = smov 8  }
 0x1a5   : > { %873 = dma.vmem_to_hbm [thread:$0]  (%p1215_p10), %s1404_s10, 2432, %s1402_s6, %s637_s15, %s1101_s7, %s1101_s7, %s1102_s8  }
 0x1a6 PF: > { %s666_s11 = sand.u32 1, %s1071_s12   ;;  %p1475_p12 = scmp.ne.s32.totalorder %s1466_s23, 0 }
 0x1a7   : > { %p1476_p13 = scmp.ge.s32.totalorder %s1091_s17, 2  ;;  %s667_s27 = scalar_lea.sflag [#allocation5], %s666_s11 }
 0x1a9   : > { %p884_p0 = pnand %p1476_p13, %p1475_p12 }
 0x1ab   : > { %1066 = dma.done.wait (!%p884_p0), %s667_s27, 2432  }
 0x1ac   : > { %1068 = vsyncadd (!%p884_p0), %s667_s27, 4294964864  ;;  %s20_s17 = sadd.s32 1, %s1091_s17   ;;  %s1477_s12 = smov %s1075_s13 }
 0x1ad   : > { %p17_p5 = scmp.ge.s32.totalorder %s20_s17, 4   ;;  %s1478_s13 = smov %s1079_s14 }
 0x1ae   : > { %s1479_s14 = smov %s1224_s5  ;;  %s1480_s15 = smov %s1087_s16 }
 0x1af   : > { %s1481_s16 = smov %s1483_s28  ;;  %19 = sbr.rel (!%p17_p5) target bundleno = 7 (0x7), region = 93 }
 0x1b6   :  { %672 = vsyncpa [#allocation4], 1 }
 0x1b7   :  { %674 = vsyncpa [#allocation4 + $0x1], 1 }
 0x1b8   :  { %675 = vsyncpa [#allocation7], 1 }
 0x1b9   :  { %676 = vsyncpa [#allocation5], 1 }
 0x1ba   :  { %678 = vsyncpa [#allocation5 + $0x1], 1 }

</bundles_post_ra>
